<compile_context>
chip_gen: v6e
topology: v6e:2x2x1
jax: 0.10.0
libtpu: 0.0.40
codegen_flags: <defaults>
</compile_context>

<pallas_src>
import functools

import jax
import jax.numpy as jnp
from jax import lax
from jax.experimental import pallas as pl
from jax.experimental.pallas import tpu as pltpu


# ----------------------------------------------------------------------------
# Small helpers
# ----------------------------------------------------------------------------
def _floordiv_const(x, d, upper):
    """x // d for non-negative int32 `x` in [0, upper); d, upper static Python ints.

    Implemented with compares + adds only (no vector integer division needed)."""
    if d == 1:
        return x
    q = jnp.zeros_like(x)
    thr = d
    while thr < upper:
        q = q + (x >= thr).astype(jnp.int32)
        thr += d
    return q


def _im2col_nhwc(x_nhwc, k=3, stride=2, pad=1):
    """Standard zero-padded im2col; row = (b, ho, wo) row-major, col = (di*k+dj)*C + c."""
    N, H, W, C = x_nhwc.shape
    xp = jnp.pad(x_nhwc, ((0, 0), (pad, pad), (pad, pad), (0, 0)))
    Ho = (H + 2 * pad - k) // stride + 1
    Wo = (W + 2 * pad - k) // stride + 1
    cols = []
    for di in range(k):
        for dj in range(k):
            cols.append(xp[:, di:di + stride * Ho:stride, dj:dj + stride * Wo:stride, :])
    patches = jnp.concatenate(cols, axis=-1)
    return patches.reshape(N * Ho * Wo, k * k * C), (N, Ho, Wo)


# ----------------------------------------------------------------------------
# Fused Pallas kernel: conv1 + conv2 (in-kernel im2col) + pool + all heads
# ----------------------------------------------------------------------------
def _hypernet_fused_kernel(p1_ref, w1_ref, b1_ref, w2_ref, b2_ref, wh_ref, bh_ref,
                           o_ref, *, n, h1, w1, h2, w2, k, stride, pad):
    # ---- conv1 (pre-im2col'd, K zero-padded to 32): (M1,32)@(32,Cmid)+b1, LeakyReLU(0.2)
    a1 = jnp.dot(p1_ref[...], w1_ref[...], preferred_element_type=jnp.float32) + b1_ref[...]
    y1 = jnp.where(a1 > 0.0, a1, 0.2 * a1).astype(jnp.bfloat16)            # (M1, Cmid)

    taps = k * k
    m1 = n * h1 * w1        # conv1 output rows  (= conv2 input rows)
    m2 = n * h2 * w2        # conv2 output rows

    # ---- conv2 im2col selection mask, generated IN-KERNEL (no HBM operand).
    #      Row r = t*m2 + o (tap-major), column s = source row of y1.
    shp = (taps * m2, m1)
    r = lax.broadcasted_iota(jnp.int32, shp, 0)
    s = lax.broadcasted_iota(jnp.int32, shp, 1)
    t = _floordiv_const(r, m2, taps * m2)
    o = r - m2 * t
    di = _floordiv_const(t, k, taps)
    dj = t - k * di
    b = _floordiv_const(o, h2 * w2, m2)
    rem = o - (h2 * w2) * b
    ho = _floordiv_const(rem, w2, h2 * w2)
    wo = rem - w2 * ho
    hi = stride * ho + di - pad
    wi = stride * wo + dj - pad
    valid = (hi >= 0) & (hi < h1) & (wi >= 0) & (wi < w1)                  # zero-pad taps
    src = b * (h1 * w1) + hi * w1 + wi
    g = jnp.where(valid & (s == src), 1.0, 0.0).astype(jnp.bfloat16)       # (taps*m2, M1)

    # ---- ONE gather matmul selects all 9 taps at once (exact 0/1 selection).
    pg = jnp.dot(g, y1, preferred_element_type=jnp.float32)                # (taps*m2, Cmid)
    pg = pg.astype(jnp.bfloat16)                                           # exact round-trip

    # ---- per-tap weight matmuls: 9 small *independent* MXU ops (static sublane
    #      slices of pg), summed on the VPU -- no serial accumulation chain.
    w2_full = w2_ref[...]                                                  # (taps, Cmid, Cout)
    a2 = b2_ref[...]                                                       # (1, Cout) f32
    for ti in range(taps):
        a2 = a2 + jnp.dot(pg[ti * m2:(ti + 1) * m2, :], w2_full[ti],
                          preferred_element_type=jnp.float32)
    y2 = jnp.where(a2 > 0.0, a2, 0.2 * a2)                                 # (m2, Cout) f32

    # ---- pool BEFORE the head matmul (GAP over shots*H*W, then Linear; the
    #      'v1' head contract pools across shots as well).
    pooled = jnp.mean(y2, axis=0, keepdims=True).astype(jnp.bfloat16)      # (1, Cout)
    o_ref[...] = (jnp.dot(pooled, wh_ref[...], preferred_element_type=jnp.float32)
                  + bh_ref[...])                                           # (1, total_padded)


def _full_spec(shape):
    nd = len(shape)
    return pl.BlockSpec(shape, lambda i, nd=nd: (0,) * nd)


def _fused_forward_call(p1, w1, b1, w2, b2, wh, bh, *, n, h1, w1sp, h2, w2sp,
                        k, stride, pad):
    total_padded = wh.shape[1]
    kernel = functools.partial(_hypernet_fused_kernel, n=n, h1=h1, w1=w1sp,
                               h2=h2, w2=w2sp, k=k, stride=stride, pad=pad)
    return pl.pallas_call(
        kernel,
        out_shape=jax.ShapeDtypeStruct((1, total_padded), jnp.float32),
        grid=(1,),
        in_specs=[_full_spec(a.shape) for a in (p1, w1, b1, w2, b2, wh, bh)],
        out_specs=_full_spec((1, total_padded)),
        compiler_params=pltpu.CompilerParams(dimension_semantics=("arbitrary",)),
    )(p1, w1, b1, w2, b2, wh, bh)


# ----------------------------------------------------------------------------
# Jitted glue: layout transpose + conv1 im2col (6 KiB input, one fused XLA op)
# ----------------------------------------------------------------------------
@functools.partial(jax.jit, static_argnames=("widths",))
def hypernet_forward(params, support_images_nchw, widths):
    k, stride, pad = 3, 2, 1
    x = jnp.transpose(support_images_nchw, (0, 2, 3, 1)).astype(jnp.float32)   # NCHW -> NHWC
    p1, (n, h1, w1sp) = _im2col_nhwc(x, k, stride, pad)
    kpad = params["w1"].shape[0]
    p1 = jnp.pad(p1, ((0, 0), (0, kpad - p1.shape[1]))).astype(jnp.bfloat16)   # K 27 -> 32
    h2 = (h1 + 2 * pad - k) // stride + 1
    w2sp = (w1sp + 2 * pad - k) // stride + 1

    out = _fused_forward_call(p1, params["w1"], params["b1"], params["w2"],
                              params["b2"], params["wh"], params["bh"],
                              n=n, h1=h1, w1sp=w1sp, h2=h2, w2sp=w2sp,
                              k=k, stride=stride, pad=pad)                     # (1, padded)
    total = sum(widths)
    out = out[:, :total]
    outs, off = [], 0
    for w in widths:
        outs.append(out[:, off:off + w])
        off += w
    return tuple(outs)


# ----------------------------------------------------------------------------
# Pure-JAX f32 reference (mirrors the PyTorch module end-to-end in f32)
# ----------------------------------------------------------------------------
def reference_forward(ref_params, x_nchw, widths):
    x = jnp.transpose(x_nchw, (0, 2, 3, 1)).astype(jnp.float32)
    p1, (n, h1, w1sp) = _im2col_nhwc(x, 3, 2, 1)
    y1 = p1 @ ref_params["w1"] + ref_params["b1"]
    y1 = jnp.where(y1 > 0.0, y1, 0.2 * y1).reshape(n, h1, w1sp, -1)
    p2, _ = _im2col_nhwc(y1, 3, 2, 1)
    y2 = p2 @ ref_params["w2"] + ref_params["b2"]
    y2 = jnp.where(y2 > 0.0, y2, 0.2 * y2)
    pooled = jnp.mean(y2, axis=0, keepdims=True)               # GAP over shots, H, W
    return pooled @ ref_params["wh"] + ref_params["bh"]        # (1, sum(widths))


# ----------------------------------------------------------------------------
# HyperNet: deterministic parameter init + forward
# ----------------------------------------------------------------------------
class HyperNetPallas:
    def __init__(self, num_support_shot, output_style_widths, key,
                 in_ch=3, mid_ch=16, backbone_out_ch=32, init_std=0.02):
        self.num_support_shot = num_support_shot
        self.widths = tuple(int(w) for w in output_style_widths)
        self.total = sum(self.widths)
        k = 3
        keys = jax.random.split(key, 2 + len(self.widths))
        # init_type='normal' (DCGAN-style N(0, 0.02)); biases zero.
        w1 = init_std * jax.random.normal(keys[0], (k * k * in_ch, mid_ch), jnp.float32)
        w2 = init_std * jax.random.normal(keys[1], (k * k * mid_ch, backbone_out_ch), jnp.float32)
        head_ws = [init_std * jax.random.normal(keys[2 + i], (backbone_out_ch, w), jnp.float32)
                   for i, w in enumerate(self.widths)]
        wh = jnp.concatenate(head_ws, axis=1)                               # (out, total)

        # f32 reference copies (natural layouts, unpadded) for the correctness check.
        self.ref_params = {
            "w1": w1, "b1": jnp.zeros((1, mid_ch), jnp.float32),
            "w2": w2, "b2": jnp.zeros((1, backbone_out_ch), jnp.float32),
            "wh": wh, "bh": jnp.zeros((1, self.total), jnp.float32),
        }

        # Kernel params: bf16 MXU operands, sublane/lane-friendly padding.
        kpad = ((k * k * in_ch + 7) // 8) * 8                               # 27 -> 32
        tpad = ((self.total + 127) // 128) * 128                            # 448 -> 512
        w1p = jnp.zeros((kpad, mid_ch), jnp.float32).at[:k * k * in_ch].set(w1)
        whp = jnp.zeros((backbone_out_ch, tpad), jnp.float32).at[:, :self.total].set(wh)
        self.params = {
            "w1": w1p.astype(jnp.bfloat16),                                 # (32, mid)
            "b1": jnp.zeros((1, mid_ch), jnp.float32),
            "w2": w2.reshape(k * k, mid_ch, backbone_out_ch).astype(jnp.bfloat16),  # (9,mid,out)
            "b2": jnp.zeros((1, backbone_out_ch), jnp.float32),
            "wh": whp.astype(jnp.bfloat16),                                 # (out, 512)
            "bh": jnp.zeros((1, tpad), jnp.float32),
        }
        # TODO(synk): gradient-freezing of the backbone (freeze_backbone / init_weights)
        # is a training-time concern with no forward-pass equivalent.

    def __call__(self, support_images_nchw):
        # Backbone feature map never leaves VMEM; only head outputs are returned.
        return hypernet_forward(self.params, support_images_nchw, widths=self.widths)


# ----------------------------------------------------------------------------
if __name__ == "__main__":
    key = jax.random.PRNGKey(0)
    k_img, k_params = jax.random.split(key)

    num_support_shot = 2
    output_style_widths = [64, 128, 256]
    # PyTorch-convention input: NCHW support images.
    support_images = jax.random.normal(k_img, (num_support_shot, 3, 16, 16), jnp.float32)

    net = HyperNetPallas(num_support_shot, output_style_widths, k_params)
    outs = net(support_images)
    outs = jax.block_until_ready(outs)

    expected_shapes = [(1, w) for w in output_style_widths]
    got_shapes = [tuple(o.shape) for o in outs]
    assert got_shapes == expected_shapes, (got_shapes, expected_shapes)
    assert all(bool(jnp.all(jnp.isfinite(o))) for o in outs)

    # Tolerance-checked pure-JAX f32 reference (covers bf16 MXU-operand rounding).
    ref_cat = reference_forward(net.ref_params, support_images, net.widths)
    out_cat = jnp.concatenate(outs, axis=1)
    err = float(jnp.max(jnp.abs(out_cat - ref_cat)))
    scale = float(jnp.max(jnp.abs(ref_cat)))
    assert err <= 1e-3 + 5e-2 * scale, (err, scale)

    print("KERNEL_OK")
</pallas_src>

<mosaic_0001>
module attributes {stable_mosaic.version = 11 : i64} {
  func.func @_hypernet_fused_kernel(%arg0: i32, %arg1: memref<128x32xbf16, #tpu.memory_space<vmem>>, %arg2: memref<32x16xbf16, #tpu.memory_space<vmem>>, %arg3: memref<1x16xf32, #tpu.memory_space<vmem>>, %arg4: memref<9x16x32xbf16, #tpu.memory_space<vmem>>, %arg5: memref<1x32xf32, #tpu.memory_space<vmem>>, %arg6: memref<32x512xbf16, #tpu.memory_space<vmem>>, %arg7: memref<1x512xf32, #tpu.memory_space<vmem>>, %arg8: memref<1x512xf32, #tpu.memory_space<vmem>>) attributes {dimension_semantics = [#tpu.dimension_semantics<arbitrary>], iteration_bounds = array<i64: 1>, scalar_prefetch = 0 : i64, scratch_operands = 0 : i64, tpu.core_type = #tpu.core_type<tc>, window_params = [{pipeline_mode = #tpu.pipeline_mode<synchronous>, transform_indices = @transform_0, window_bounds = array<i64: 128, 32>}, {pipeline_mode = #tpu.pipeline_mode<synchronous>, transform_indices = @transform_1, window_bounds = array<i64: 32, 16>}, {pipeline_mode = #tpu.pipeline_mode<synchronous>, transform_indices = @transform_2, window_bounds = array<i64: 1, 16>}, {pipeline_mode = #tpu.pipeline_mode<synchronous>, transform_indices = @transform_3, window_bounds = array<i64: 9, 16, 32>}, {pipeline_mode = #tpu.pipeline_mode<synchronous>, transform_indices = @transform_4, window_bounds = array<i64: 1, 32>}, {pipeline_mode = #tpu.pipeline_mode<synchronous>, transform_indices = @transform_5, window_bounds = array<i64: 32, 512>}, {pipeline_mode = #tpu.pipeline_mode<synchronous>, transform_indices = @transform_6, window_bounds = array<i64: 1, 512>}, {pipeline_mode = #tpu.pipeline_mode<synchronous>, transform_indices = @transform_7, window_bounds = array<i64: 1, 512>}]} {
    %c0 = arith.constant 0 : index
    %c0_0 = arith.constant 0 : index
    %0 = vector.load %arg1[%c0, %c0_0] : memref<128x32xbf16, #tpu.memory_space<vmem>>, vector<128x32xbf16>
    %c0_1 = arith.constant 0 : index
    %c0_2 = arith.constant 0 : index
    %1 = vector.load %arg2[%c0_1, %c0_2] : memref<32x16xbf16, #tpu.memory_space<vmem>>, vector<32x16xbf16>
    %cst = arith.constant dense<0.000000e+00> : vector<128x16xf32>
    %2 = tpu.matmul %0, %1, %cst {dimension_numbers = #tpu.dot_dimension_numbers<[1], [0], [0], [1], [0, 0, 1, 1], [], []>} : vector<128x32xbf16>, vector<32x16xbf16>, vector<128x16xf32> -> vector<128x16xf32>
    %c0_3 = arith.constant 0 : index
    %c0_4 = arith.constant 0 : index
    %3 = vector.load %arg3[%c0_3, %c0_4] : memref<1x16xf32, #tpu.memory_space<vmem>>, vector<1x16xf32>
    %4 = vector.broadcast %3 : vector<1x16xf32> to vector<128x16xf32>
    %5 = arith.addf %2, %4 : vector<128x16xf32>
    %cst_5 = arith.constant 0.000000e+00 : f32
    %6 = vector.broadcast %cst_5 : f32 to vector<128x16xf32>
    %7 = arith.cmpf ogt, %5, %6 : vector<128x16xf32>
    %cst_6 = arith.constant 2.000000e-01 : f32
    %8 = vector.broadcast %cst_6 : f32 to vector<128x16xf32>
    %9 = arith.mulf %8, %5 : vector<128x16xf32>
    %10 = arith.select %7, %5, %9 : vector<128x16xi1>, vector<128x16xf32>
    %11 = arith.truncf %10 : vector<128x16xf32> to vector<128x16xbf16>
    %12 = tpu.iota {dimensions = array<i32: 0>} : vector<288x128xi32>
    %13 = tpu.iota {dimensions = array<i32: 1>} : vector<288x128xi32>
    %c0_i32 = arith.constant 0 : i32
    %14 = vector.broadcast %c0_i32 : i32 to vector<288x128xi32>
    %c32_i32 = arith.constant 32 : i32
    %15 = vector.broadcast %c32_i32 : i32 to vector<288x128xi32>
    %16 = arith.cmpi sge, %12, %15 : vector<288x128xi32>
    %17 = arith.extui %16 : vector<288x128xi1> to vector<288x128xi32>
    %18 = arith.addi %14, %17 : vector<288x128xi32>
    %c64_i32 = arith.constant 64 : i32
    %19 = vector.broadcast %c64_i32 : i32 to vector<288x128xi32>
    %20 = arith.cmpi sge, %12, %19 : vector<288x128xi32>
    %21 = arith.extui %20 : vector<288x128xi1> to vector<288x128xi32>
    %22 = arith.addi %18, %21 : vector<288x128xi32>
    %c96_i32 = arith.constant 96 : i32
    %23 = vector.broadcast %c96_i32 : i32 to vector<288x128xi32>
    %24 = arith.cmpi sge, %12, %23 : vector<288x128xi32>
    %25 = arith.extui %24 : vector<288x128xi1> to vector<288x128xi32>
    %26 = arith.addi %22, %25 : vector<288x128xi32>
    %c128_i32 = arith.constant 128 : i32
    %27 = vector.broadcast %c128_i32 : i32 to vector<288x128xi32>
    %28 = arith.cmpi sge, %12, %27 : vector<288x128xi32>
    %29 = arith.extui %28 : vector<288x128xi1> to vector<288x128xi32>
    %30 = arith.addi %26, %29 : vector<288x128xi32>
    %c160_i32 = arith.constant 160 : i32
    %31 = vector.broadcast %c160_i32 : i32 to vector<288x128xi32>
    %32 = arith.cmpi sge, %12, %31 : vector<288x128xi32>
    %33 = arith.extui %32 : vector<288x128xi1> to vector<288x128xi32>
    %34 = arith.addi %30, %33 : vector<288x128xi32>
    %c192_i32 = arith.constant 192 : i32
    %35 = vector.broadcast %c192_i32 : i32 to vector<288x128xi32>
    %36 = arith.cmpi sge, %12, %35 : vector<288x128xi32>
    %37 = arith.extui %36 : vector<288x128xi1> to vector<288x128xi32>
    %38 = arith.addi %34, %37 : vector<288x128xi32>
    %c224_i32 = arith.constant 224 : i32
    %39 = vector.broadcast %c224_i32 : i32 to vector<288x128xi32>
    %40 = arith.cmpi sge, %12, %39 : vector<288x128xi32>
    %41 = arith.extui %40 : vector<288x128xi1> to vector<288x128xi32>
    %42 = arith.addi %38, %41 : vector<288x128xi32>
    %c256_i32 = arith.constant 256 : i32
    %43 = vector.broadcast %c256_i32 : i32 to vector<288x128xi32>
    %44 = arith.cmpi sge, %12, %43 : vector<288x128xi32>
    %45 = arith.extui %44 : vector<288x128xi1> to vector<288x128xi32>
    %46 = arith.addi %42, %45 : vector<288x128xi32>
    %c32_i32_7 = arith.constant 32 : i32
    %47 = vector.broadcast %c32_i32_7 : i32 to vector<288x128xi32>
    %48 = arith.muli %47, %46 : vector<288x128xi32>
    %49 = arith.subi %12, %48 : vector<288x128xi32>
    %c0_i32_8 = arith.constant 0 : i32
    %50 = vector.broadcast %c0_i32_8 : i32 to vector<288x128xi32>
    %c3_i32 = arith.constant 3 : i32
    %51 = vector.broadcast %c3_i32 : i32 to vector<288x128xi32>
    %52 = arith.cmpi sge, %46, %51 : vector<288x128xi32>
    %53 = arith.extui %52 : vector<288x128xi1> to vector<288x128xi32>
    %54 = arith.addi %50, %53 : vector<288x128xi32>
    %c6_i32 = arith.constant 6 : i32
    %55 = vector.broadcast %c6_i32 : i32 to vector<288x128xi32>
    %56 = arith.cmpi sge, %46, %55 : vector<288x128xi32>
    %57 = arith.extui %56 : vector<288x128xi1> to vector<288x128xi32>
    %58 = arith.addi %54, %57 : vector<288x128xi32>
    %c3_i32_9 = arith.constant 3 : i32
    %59 = vector.broadcast %c3_i32_9 : i32 to vector<288x128xi32>
    %60 = arith.muli %59, %58 : vector<288x128xi32>
    %61 = arith.subi %46, %60 : vector<288x128xi32>
    %c0_i32_10 = arith.constant 0 : i32
    %62 = vector.broadcast %c0_i32_10 : i32 to vector<288x128xi32>
    %c16_i32 = arith.constant 16 : i32
    %63 = vector.broadcast %c16_i32 : i32 to vector<288x128xi32>
    %64 = arith.cmpi sge, %49, %63 : vector<288x128xi32>
    %65 = arith.extui %64 : vector<288x128xi1> to vector<288x128xi32>
    %66 = arith.addi %62, %65 : vector<288x128xi32>
    %c16_i32_11 = arith.constant 16 : i32
    %67 = vector.broadcast %c16_i32_11 : i32 to vector<288x128xi32>
    %68 = arith.muli %67, %66 : vector<288x128xi32>
    %69 = arith.subi %49, %68 : vector<288x128xi32>
    %c0_i32_12 = arith.constant 0 : i32
    %70 = vector.broadcast %c0_i32_12 : i32 to vector<288x128xi32>
    %c4_i32 = arith.constant 4 : i32
    %71 = vector.broadcast %c4_i32 : i32 to vector<288x128xi32>
    %72 = arith.cmpi sge, %69, %71 : vector<288x128xi32>
    %73 = arith.extui %72 : vector<288x128xi1> to vector<288x128xi32>
    %74 = arith.addi %70, %73 : vector<288x128xi32>
    %c8_i32 = arith.constant 8 : i32
    %75 = vector.broadcast %c8_i32 : i32 to vector<288x128xi32>
    %76 = arith.cmpi sge, %69, %75 : vector<288x128xi32>
    %77 = arith.extui %76 : vector<288x128xi1> to vector<288x128xi32>
    %78 = arith.addi %74, %77 : vector<288x128xi32>
    %c12_i32 = arith.constant 12 : i32
    %79 = vector.broadcast %c12_i32 : i32 to vector<288x128xi32>
    %80 = arith.cmpi sge, %69, %79 : vector<288x128xi32>
    %81 = arith.extui %80 : vector<288x128xi1> to vector<288x128xi32>
    %82 = arith.addi %78, %81 : vector<288x128xi32>
    %c4_i32_13 = arith.constant 4 : i32
    %83 = vector.broadcast %c4_i32_13 : i32 to vector<288x128xi32>
    %84 = arith.muli %83, %82 : vector<288x128xi32>
    %85 = arith.subi %69, %84 : vector<288x128xi32>
    %c2_i32 = arith.constant 2 : i32
    %86 = vector.broadcast %c2_i32 : i32 to vector<288x128xi32>
    %87 = arith.muli %86, %82 : vector<288x128xi32>
    %88 = arith.addi %87, %58 : vector<288x128xi32>
    %c1_i32 = arith.constant 1 : i32
    %89 = vector.broadcast %c1_i32 : i32 to vector<288x128xi32>
    %90 = arith.subi %88, %89 : vector<288x128xi32>
    %c2_i32_14 = arith.constant 2 : i32
    %91 = vector.broadcast %c2_i32_14 : i32 to vector<288x128xi32>
    %92 = arith.muli %91, %85 : vector<288x128xi32>
    %93 = arith.addi %92, %61 : vector<288x128xi32>
    %c1_i32_15 = arith.constant 1 : i32
    %94 = vector.broadcast %c1_i32_15 : i32 to vector<288x128xi32>
    %95 = arith.subi %93, %94 : vector<288x128xi32>
    %c0_i32_16 = arith.constant 0 : i32
    %96 = vector.broadcast %c0_i32_16 : i32 to vector<288x128xi32>
    %97 = arith.cmpi sge, %90, %96 : vector<288x128xi32>
    %c8_i32_17 = arith.constant 8 : i32
    %98 = vector.broadcast %c8_i32_17 : i32 to vector<288x128xi32>
    %99 = arith.cmpi slt, %90, %98 : vector<288x128xi32>
    %100 = arith.andi %97, %99 : vector<288x128xi1>
    %c0_i32_18 = arith.constant 0 : i32
    %101 = vector.broadcast %c0_i32_18 : i32 to vector<288x128xi32>
    %102 = arith.cmpi sge, %95, %101 : vector<288x128xi32>
    %103 = arith.andi %100, %102 : vector<288x128xi1>
    %c8_i32_19 = arith.constant 8 : i32
    %104 = vector.broadcast %c8_i32_19 : i32 to vector<288x128xi32>
    %105 = arith.cmpi slt, %95, %104 : vector<288x128xi32>
    %106 = arith.andi %103, %105 : vector<288x128xi1>
    %c64_i32_20 = arith.constant 64 : i32
    %107 = vector.broadcast %c64_i32_20 : i32 to vector<288x128xi32>
    %108 = arith.muli %66, %107 : vector<288x128xi32>
    %c8_i32_21 = arith.constant 8 : i32
    %109 = vector.broadcast %c8_i32_21 : i32 to vector<288x128xi32>
    %110 = arith.muli %90, %109 : vector<288x128xi32>
    %111 = arith.addi %108, %110 : vector<288x128xi32>
    %112 = arith.addi %111, %95 : vector<288x128xi32>
    %113 = arith.cmpi eq, %13, %112 : vector<288x128xi32>
    %114 = arith.andi %106, %113 : vector<288x128xi1>
    %cst_22 = arith.constant 1.000000e+00 : f32
    %cst_23 = arith.constant 0.000000e+00 : f32
    %115 = vector.broadcast %cst_22 : f32 to vector<288x128xf32>
    %116 = vector.broadcast %cst_23 : f32 to vector<288x128xf32>
    %117 = arith.select %114, %115, %116 : vector<288x128xi1>, vector<288x128xf32>
    %118 = arith.truncf %117 : vector<288x128xf32> to vector<288x128xbf16>
    %cst_24 = arith.constant dense<0.000000e+00> : vector<288x16xf32>
    %119 = tpu.matmul %118, %11, %cst_24 {dimension_numbers = #tpu.dot_dimension_numbers<[1], [0], [0], [1], [0, 0, 1, 1], [], []>} : vector<288x128xbf16>, vector<128x16xbf16>, vector<288x16xf32> -> vector<288x16xf32>
    %120 = arith.truncf %119 : vector<288x16xf32> to vector<288x16xbf16>
    %c0_25 = arith.constant 0 : index
    %c0_26 = arith.constant 0 : index
    %c0_27 = arith.constant 0 : index
    %121 = vector.load %arg4[%c0_25, %c0_26, %c0_27] : memref<9x16x32xbf16, #tpu.memory_space<vmem>>, vector<9x16x32xbf16>
    %c0_28 = arith.constant 0 : index
    %c0_29 = arith.constant 0 : index
    %122 = vector.load %arg5[%c0_28, %c0_29] : memref<1x32xf32, #tpu.memory_space<vmem>>, vector<1x32xf32>
    %123 = vector.extract_strided_slice %120 {offsets = [0, 0], sizes = [32, 16], strides = [1, 1]} : vector<288x16xbf16> to vector<32x16xbf16>
    %124 = vector.extract_strided_slice %121 {offsets = [0, 0, 0], sizes = [1, 16, 32], strides = [1, 1, 1]} : vector<9x16x32xbf16> to vector<1x16x32xbf16>
    %125 = vector.shape_cast %124 : vector<1x16x32xbf16> to vector<16x32xbf16>
    %cst_30 = arith.constant dense<0.000000e+00> : vector<32x32xf32>
    %126 = tpu.matmul %123, %125, %cst_30 {dimension_numbers = #tpu.dot_dimension_numbers<[1], [0], [0], [1], [0, 0, 1, 1], [], []>} : vector<32x16xbf16>, vector<16x32xbf16>, vector<32x32xf32> -> vector<32x32xf32>
    %127 = vector.broadcast %122 : vector<1x32xf32> to vector<32x32xf32>
    %128 = arith.addf %127, %126 : vector<32x32xf32>
    %129 = vector.extract_strided_slice %120 {offsets = [32, 0], sizes = [32, 16], strides = [1, 1]} : vector<288x16xbf16> to vector<32x16xbf16>
    %130 = vector.extract_strided_slice %121 {offsets = [1, 0, 0], sizes = [1, 16, 32], strides = [1, 1, 1]} : vector<9x16x32xbf16> to vector<1x16x32xbf16>
    %131 = vector.shape_cast %130 : vector<1x16x32xbf16> to vector<16x32xbf16>
    %cst_31 = arith.constant dense<0.000000e+00> : vector<32x32xf32>
    %132 = tpu.matmul %129, %131, %cst_31 {dimension_numbers = #tpu.dot_dimension_numbers<[1], [0], [0], [1], [0, 0, 1, 1], [], []>} : vector<32x16xbf16>, vector<16x32xbf16>, vector<32x32xf32> -> vector<32x32xf32>
    %133 = arith.addf %128, %132 : vector<32x32xf32>
    %134 = vector.extract_strided_slice %120 {offsets = [64, 0], sizes = [32, 16], strides = [1, 1]} : vector<288x16xbf16> to vector<32x16xbf16>
    %135 = vector.extract_strided_slice %121 {offsets = [2, 0, 0], sizes = [1, 16, 32], strides = [1, 1, 1]} : vector<9x16x32xbf16> to vector<1x16x32xbf16>
    %136 = vector.shape_cast %135 : vector<1x16x32xbf16> to vector<16x32xbf16>
    %cst_32 = arith.constant dense<0.000000e+00> : vector<32x32xf32>
    %137 = tpu.matmul %134, %136, %cst_32 {dimension_numbers = #tpu.dot_dimension_numbers<[1], [0], [0], [1], [0, 0, 1, 1], [], []>} : vector<32x16xbf16>, vector<16x32xbf16>, vector<32x32xf32> -> vector<32x32xf32>
    %138 = arith.addf %133, %137 : vector<32x32xf32>
    %139 = vector.extract_strided_slice %120 {offsets = [96, 0], sizes = [32, 16], strides = [1, 1]} : vector<288x16xbf16> to vector<32x16xbf16>
    %140 = vector.extract_strided_slice %121 {offsets = [3, 0, 0], sizes = [1, 16, 32], strides = [1, 1, 1]} : vector<9x16x32xbf16> to vector<1x16x32xbf16>
    %141 = vector.shape_cast %140 : vector<1x16x32xbf16> to vector<16x32xbf16>
    %cst_33 = arith.constant dense<0.000000e+00> : vector<32x32xf32>
    %142 = tpu.matmul %139, %141, %cst_33 {dimension_numbers = #tpu.dot_dimension_numbers<[1], [0], [0], [1], [0, 0, 1, 1], [], []>} : vector<32x16xbf16>, vector<16x32xbf16>, vector<32x32xf32> -> vector<32x32xf32>
    %143 = arith.addf %138, %142 : vector<32x32xf32>
    %144 = vector.extract_strided_slice %120 {offsets = [128, 0], sizes = [32, 16], strides = [1, 1]} : vector<288x16xbf16> to vector<32x16xbf16>
    %145 = vector.extract_strided_slice %121 {offsets = [4, 0, 0], sizes = [1, 16, 32], strides = [1, 1, 1]} : vector<9x16x32xbf16> to vector<1x16x32xbf16>
    %146 = vector.shape_cast %145 : vector<1x16x32xbf16> to vector<16x32xbf16>
    %cst_34 = arith.constant dense<0.000000e+00> : vector<32x32xf32>
    %147 = tpu.matmul %144, %146, %cst_34 {dimension_numbers = #tpu.dot_dimension_numbers<[1], [0], [0], [1], [0, 0, 1, 1], [], []>} : vector<32x16xbf16>, vector<16x32xbf16>, vector<32x32xf32> -> vector<32x32xf32>
    %148 = arith.addf %143, %147 : vector<32x32xf32>
    %149 = vector.extract_strided_slice %120 {offsets = [160, 0], sizes = [32, 16], strides = [1, 1]} : vector<288x16xbf16> to vector<32x16xbf16>
    %150 = vector.extract_strided_slice %121 {offsets = [5, 0, 0], sizes = [1, 16, 32], strides = [1, 1, 1]} : vector<9x16x32xbf16> to vector<1x16x32xbf16>
    %151 = vector.shape_cast %150 : vector<1x16x32xbf16> to vector<16x32xbf16>
    %cst_35 = arith.constant dense<0.000000e+00> : vector<32x32xf32>
    %152 = tpu.matmul %149, %151, %cst_35 {dimension_numbers = #tpu.dot_dimension_numbers<[1], [0], [0], [1], [0, 0, 1, 1], [], []>} : vector<32x16xbf16>, vector<16x32xbf16>, vector<32x32xf32> -> vector<32x32xf32>
    %153 = arith.addf %148, %152 : vector<32x32xf32>
    %154 = vector.extract_strided_slice %120 {offsets = [192, 0], sizes = [32, 16], strides = [1, 1]} : vector<288x16xbf16> to vector<32x16xbf16>
    %155 = vector.extract_strided_slice %121 {offsets = [6, 0, 0], sizes = [1, 16, 32], strides = [1, 1, 1]} : vector<9x16x32xbf16> to vector<1x16x32xbf16>
    %156 = vector.shape_cast %155 : vector<1x16x32xbf16> to vector<16x32xbf16>
    %cst_36 = arith.constant dense<0.000000e+00> : vector<32x32xf32>
    %157 = tpu.matmul %154, %156, %cst_36 {dimension_numbers = #tpu.dot_dimension_numbers<[1], [0], [0], [1], [0, 0, 1, 1], [], []>} : vector<32x16xbf16>, vector<16x32xbf16>, vector<32x32xf32> -> vector<32x32xf32>
    %158 = arith.addf %153, %157 : vector<32x32xf32>
    %159 = vector.extract_strided_slice %120 {offsets = [224, 0], sizes = [32, 16], strides = [1, 1]} : vector<288x16xbf16> to vector<32x16xbf16>
    %160 = vector.extract_strided_slice %121 {offsets = [7, 0, 0], sizes = [1, 16, 32], strides = [1, 1, 1]} : vector<9x16x32xbf16> to vector<1x16x32xbf16>
    %161 = vector.shape_cast %160 : vector<1x16x32xbf16> to vector<16x32xbf16>
    %cst_37 = arith.constant dense<0.000000e+00> : vector<32x32xf32>
    %162 = tpu.matmul %159, %161, %cst_37 {dimension_numbers = #tpu.dot_dimension_numbers<[1], [0], [0], [1], [0, 0, 1, 1], [], []>} : vector<32x16xbf16>, vector<16x32xbf16>, vector<32x32xf32> -> vector<32x32xf32>
    %163 = arith.addf %158, %162 : vector<32x32xf32>
    %164 = vector.extract_strided_slice %120 {offsets = [256, 0], sizes = [32, 16], strides = [1, 1]} : vector<288x16xbf16> to vector<32x16xbf16>
    %165 = vector.extract_strided_slice %121 {offsets = [8, 0, 0], sizes = [1, 16, 32], strides = [1, 1, 1]} : vector<9x16x32xbf16> to vector<1x16x32xbf16>
    %166 = vector.shape_cast %165 : vector<1x16x32xbf16> to vector<16x32xbf16>
    %cst_38 = arith.constant dense<0.000000e+00> : vector<32x32xf32>
    %167 = tpu.matmul %164, %166, %cst_38 {dimension_numbers = #tpu.dot_dimension_numbers<[1], [0], [0], [1], [0, 0, 1, 1], [], []>} : vector<32x16xbf16>, vector<16x32xbf16>, vector<32x32xf32> -> vector<32x32xf32>
    %168 = arith.addf %163, %167 : vector<32x32xf32>
    %cst_39 = arith.constant 0.000000e+00 : f32
    %169 = vector.broadcast %cst_39 : f32 to vector<32x32xf32>
    %170 = arith.cmpf ogt, %168, %169 : vector<32x32xf32>
    %cst_40 = arith.constant 2.000000e-01 : f32
    %171 = vector.broadcast %cst_40 : f32 to vector<32x32xf32>
    %172 = arith.mulf %171, %168 : vector<32x32xf32>
    %173 = arith.select %170, %168, %172 : vector<32x32xi1>, vector<32x32xf32>
    %cst_41 = arith.constant dense<0.000000e+00> : vector<32xf32>
    %174 = vector.multi_reduction <add>, %173, %cst_41 [0] : vector<32x32xf32> to vector<32xf32>
    %175 = vector.shape_cast %174 : vector<32xf32> to vector<1x32xf32>
    %cst_42 = arith.constant 3.200000e+01 : f32
    %176 = vector.broadcast %cst_42 : f32 to vector<1x32xf32>
    %177 = arith.divf %175, %176 : vector<1x32xf32>
    %178 = arith.truncf %177 : vector<1x32xf32> to vector<1x32xbf16>
    %c0_43 = arith.constant 0 : index
    %c0_44 = arith.constant 0 : index
    %179 = vector.load %arg6[%c0_43, %c0_44] : memref<32x512xbf16, #tpu.memory_space<vmem>>, vector<32x512xbf16>
    %cst_45 = arith.constant dense<0.000000e+00> : vector<1x512xf32>
    %180 = tpu.matmul %178, %179, %cst_45 {dimension_numbers = #tpu.dot_dimension_numbers<[1], [0], [0], [1], [0, 0, 1, 1], [], []>} : vector<1x32xbf16>, vector<32x512xbf16>, vector<1x512xf32> -> vector<1x512xf32>
    %c0_46 = arith.constant 0 : index
    %c0_47 = arith.constant 0 : index
    %181 = vector.load %arg7[%c0_46, %c0_47] : memref<1x512xf32, #tpu.memory_space<vmem>>, vector<1x512xf32>
    %182 = arith.addf %180, %181 : vector<1x512xf32>
    %c0_48 = arith.constant 0 : index
    %c0_49 = arith.constant 0 : index
    %183 = vector.load %arg8[%c0_48, %c0_49] : memref<1x512xf32, #tpu.memory_space<vmem>>, vector<1x512xf32>
    tpu.vector_store %arg8[%c0_48, %c0_49], %182 {strides = array<i32>} : memref<1x512xf32, #tpu.memory_space<vmem>>, vector<1x512xf32>,
    return
  }
  func.func @transform_0(%arg0: i32) -> (i32, i32) {
    %c0_i32 = arith.constant 0 : i32
    %c0_i32_0 = arith.constant 0 : i32
    %c0_i32_1 = arith.constant 0 : i32
    return %c0_i32, %c0_i32_0 : i32, i32
  }
  func.func @transform_1(%arg0: i32) -> (i32, i32) {
    %c0_i32 = arith.constant 0 : i32
    %c0_i32_0 = arith.constant 0 : i32
    %c0_i32_1 = arith.constant 0 : i32
    return %c0_i32, %c0_i32_0 : i32, i32
  }
  func.func @transform_2(%arg0: i32) -> (i32, i32) {
    %c0_i32 = arith.constant 0 : i32
    %c0_i32_0 = arith.constant 0 : i32
    %c0_i32_1 = arith.constant 0 : i32
    return %c0_i32, %c0_i32_0 : i32, i32
  }
  func.func @transform_3(%arg0: i32) -> (i32, i32, i32) {
    %c0_i32 = arith.constant 0 : i32
    %c0_i32_0 = arith.constant 0 : i32
    %c0_i32_1 = arith.constant 0 : i32
    %c0_i32_2 = arith.constant 0 : i32
    return %c0_i32, %c0_i32_0, %c0_i32_1 : i32, i32, i32
  }
  func.func @transform_4(%arg0: i32) -> (i32, i32) {
    %c0_i32 = arith.constant 0 : i32
    %c0_i32_0 = arith.constant 0 : i32
    %c0_i32_1 = arith.constant 0 : i32
    return %c0_i32, %c0_i32_0 : i32, i32
  }
  func.func @transform_5(%arg0: i32) -> (i32, i32) {
    %c0_i32 = arith.constant 0 : i32
    %c0_i32_0 = arith.constant 0 : i32
    %c0_i32_1 = arith.constant 0 : i32
    return %c0_i32, %c0_i32_0 : i32, i32
  }
  func.func @transform_6(%arg0: i32) -> (i32, i32) {
    %c0_i32 = arith.constant 0 : i32
    %c0_i32_0 = arith.constant 0 : i32
    %c0_i32_1 = arith.constant 0 : i32
    return %c0_i32, %c0_i32_0 : i32, i32
  }
  func.func @transform_7(%arg0: i32) -> (i32, i32) {
    %c0_i32 = arith.constant 0 : i32
    %c0_i32_0 = arith.constant 0 : i32
    %c0_i32_1 = arith.constant 0 : i32
    return %c0_i32, %c0_i32_0 : i32, i32
  }
}

</mosaic_0001>

<bundles_post_ra>
// kernel: hypernet_forward.1
= control target key start
LH: loop header
LB: loop body
LE: loop exit
PB: predicated region body
PF: predicated region fallthrough
CT: control target
= control target key end

     0   :  { %vm5086_vm0 = vcmask 261120   ;;  %v284_v10 = vlaneseq  ;;  %v4146_v16 = vmov 0   ;;  %s5078_s1 = inlined_call_operand.vmem [shape: bf16[32,16], index: 1, kind: input, shape index: {}]   ;;  %s5079_s0 = inlined_call_operand.vmem [shape: bf16[128,32], index: 0, kind: input, shape index: {}]   ;;  %s5080_s2 = inlined_call_operand.vmem [shape: f32[1,16], index: 2, kind: input, shape index: {}]   ;;  %s5081_s3 = inlined_call_operand.vmem [shape: bf16[9,16,32], index: 3, kind: input, shape index: {}]   ;;  %s5082_s5 = inlined_call_operand.vmem [shape: bf16[32,512], index: 5, kind: input, shape index: {}]   ;;  %s5083_s4 = inlined_call_operand.vmem [shape: f32[1,32], index: 4, kind: input, shape index: {}]   ;;  %s5084_s6 = inlined_call_operand.vmem [shape: f32[1,512], index: 6, kind: input, shape index: {}]   ;;  %s5085_s7 = inlined_call_operand.vmem [shape: f32[1,512], index: 7, kind: output, shape index: {}]  }
   0x1   :  { %v4115_v0 = vld [vmem:[%s5078_s1 + $0x8] sm:$0xff]   ;;  %v4116_v1 = vld [vmem:[%s5078_s1] sm:$0xff]   ;;  %v4119_v4 = vld [vmem:[%s5079_s0 + $0x10] sm:$0xff]  }
   0x2   :  { %3986 = vmatprep.subr.bf16.mxu0 %v4115_v0  ;;  %v4117_v2 = vld [vmem:[%s5079_s0] sm:$0xff]   ;;  %v4118_v3 = vld [vmem:[%s5079_s0 + $0x8] sm:$0xff]   ;;  %v4120_v5 = vld [vmem:[%s5079_s0 + $0x18] sm:$0xff]   ;;  %v4228_v11 = vshrl.u32 %v284_v10, 7  ;;  %v4248_v52 = vand.u32 127, %v284_v10 }
   0x3   :  { %3987 = vmatpush3.bf16.msra.mxu0 %v4115_v0  ;;  %3990 = vmatprep.mubr.msk.bf16.mxu0 %vm5086_vm0, %v4117_v2  ;;  %v4121_v6 = vld [vmem:[%s5079_s0 + $0x20] sm:$0xff]   ;;  %v4122_v7 = vld [vmem:[%s5079_s0 + $0x28] sm:$0xff]   ;;  %v4123_v8 = vld [vmem:[%s5079_s0 + $0x30] sm:$0xff]  }
   0x4   :  { %3988 = vmatprep.subr.bf16.mxu0 %v4116_v1  ;;  %v4124_v9 = vld [vmem:[%s5079_s0 + $0x38] sm:$0xff]   ;;  %v288_v12 = vadd.s32 24, %v4228_v11  ;;  %v286_v13 = vadd.s32 8, %v4228_v11  ;;  %v287_v14 = vadd.s32 16, %v4228_v11  ;;  %vm1619_vm3 = vcmp.ge.s32.totalorder %v4228_v11, 4 }
   0x5   :  { %v1655_v21 = vsel %vm1619_vm3, 1, %v4146_v16  ;;  %v4238_v23 = vadd.s32 56, %v4228_v11  ;;  %v290_v27 = vadd.s32 40, %v4228_v11  ;;  %v289_v30 = vadd.s32 32, %v4228_v11 }
   0x6   :  { %v3796_v15 = vadd.s32 4294967280, %v288_v12  ;;  %vm1800_vm1 = vcmp.ge.s32.totalorder %v286_v13, 12  ;;  %v3795_v18 = vadd.s32 4294967280, %v287_v14  ;;  %v1907_v24 = vmul.u32 4, %v1655_v21 }
   0x7   :  { %3989 = vmatpush3.bf16.msra.mxu0 %v4116_v1  ;;  %v1836_v17 = vsel %vm1800_vm1, 1, %v4146_v16  ;;  %v291_v31 = vadd.s32 48, %v4228_v11  ;;  %v1979_v34 = vmul.u32 2, %v1655_v21  ;;  %v4245_v47 = vadd.s32 4294967264, %v290_v27 }
   0x8   :  { %vm1802_vm2 = vcmp.ge.s32.totalorder %v3796_v15, 12  ;;  %v1872_v19 = vadd.s32 2, %v1836_v17  ;;  %vm1621_vm4 = vcmp.ge.s32.totalorder %v3795_v18, 4  ;;  %v1943_v32 = vsub.s32 %v4228_v11, %v1907_v24 }
   0x9   :  { %v1838_v20 = vsel %vm1802_vm2, 1, %v4146_v16  ;;  %v1657_v26 = vsel %vm1621_vm4, 1, %v4146_v16  ;;  %v3813_v40 = vadd.s32 4294967295, %v1979_v34  ;;  %v3765_v58 = vadd.s32 4294967264, %v291_v31 }
   0xa   :  { %3991 = vmatmul.mubr.msk.bf16.vlgmr.msra.gmra.mxu0 %vm5086_vm0, %v4118_v3  ;;  %v1874_v22 = vadd.s32 2, %v1838_v20  ;;  %v1908_v25 = vmul.u32 4, %v1872_v19  ;;  %v1909_v28 = vmul.u32 4, %v1657_v26  ;;  %v3763_v61 = vadd.s32 4294967264, %v289_v30 }
   0xb   :  { %3994 = vmatprep.mubr.msk.bf16.mxu0 %vm5086_vm0, %v4119_v4  ;;  %v1980_v35 = vmul.u32 2, %v1872_v19  ;;  %v1981_v38 = vmul.u32 2, %v1657_v26  ;;  %vm2195_vm5 = vcmp.ge.s32.totalorder %v3813_v40, 0  ;;  %vm2231_vm7 = vcmp.lt.s32.totalorder %v3813_v40, 8 }
   0xc   :  { %v1910_v29 = vmul.u32 4, %v1874_v22  ;;  %v1944_v33 = vsub.s32 %v286_v13, %v1908_v25  ;;  %v1945_v36 = vsub.s32 %v3795_v18, %v1909_v28  ;;  %v1982_v39 = vmul.u32 2, %v1874_v22  ;;  %vm2267_vm9 = vmand %vm2195_vm5, %vm2231_vm7 }
   0xd   :  { %v3814_v41 = vadd.s32 4294967295, %v1980_v35  ;;  %v2087_v42 = vmul.u32 2, %v1943_v32  ;;  %v3815_v44 = vadd.s32 4294967295, %v1981_v38  ;;  %v2483_v50 = vmul.u32 8, %v3813_v40 }
   0xe   :  { %v1946_v37 = vsub.s32 %v3796_v15, %v1910_v29  ;;  %v2088_v43 = vmul.u32 2, %v1944_v33  ;;  %v2089_v45 = vmul.u32 2, %v1945_v36  ;;  %v3816_v55 = vadd.s32 4294967295, %v1982_v39 }
   0xf   :  { %v3849_v48 = vadd.s32 4294967295, %v2087_v42  ;;  %v2484_v51 = vmul.u32 8, %v3814_v41  ;;  %vm2196_vm6 = vcmp.ge.s32.totalorder %v3814_v41, 0  ;;  %vm2232_vm8 = vcmp.lt.s32.totalorder %v3814_v41, 8 }
  0x10   :  { %v2090_v46 = vmul.u32 2, %v1946_v37  ;;  %v3850_v49 = vadd.s32 4294967295, %v2088_v43  ;;  %vm2268_vm12 = vmand %vm2196_vm6, %vm2232_vm8  ;;  %v3851_v56 = vadd.s32 4294967295, %v2089_v45  ;;  %vm2197_vm4 = vcmp.ge.s32.totalorder %v3815_v44, 0 }
  0x11   :  { %vm2303_vm10 = vcmp.ge.s32.totalorder %v3849_v48, 0  ;;  %v2555_v53 = vadd.s32 %v3849_v48, %v2483_v50  ;;  %vm2375_vm13 = vcmp.lt.s32.totalorder %v3849_v48, 8  ;;  %vm2233_vm7 = vcmp.lt.s32.totalorder %v3815_v44, 8 }
  0x12   :  { %3995 = vmatmul.mubr.msk.bf16.gmra.mxu0 %vm5086_vm0, %v4120_v5  ;;  %vm2304_vm11 = vcmp.ge.s32.totalorder %v3850_v49, 0  ;;  %v2556_v54 = vadd.s32 %v3850_v49, %v2484_v51  ;;  %vm2339_vm14 = vmand %vm2267_vm9, %vm2303_vm10  ;;  %vm2376_vm15 = vcmp.lt.s32.totalorder %v3850_v49, 8  ;;  %v3852_v57 = vadd.s32 4294967295, %v2090_v46 }
  0x13   :  { %3998 = vmatprep.mubr.msk.bf16.mxu0 %vm5086_vm0, %v4121_v6  ;;  %vm2340_vm2 = vmand %vm2268_vm12, %vm2304_vm11  ;;  %vm2234_vm6 = vcmp.lt.s32.totalorder %v3816_v55, 8  ;;  %vm2305_vm8 = vcmp.ge.s32.totalorder %v3851_v56, 0  ;;  %v2485_v59 = vmul.u32 8, %v3815_v44  ;;  %v2486_v60 = vmul.u32 8, %v3816_v55 }
  0x14   :  { %vm2411_vm5 = vmand %vm2339_vm14, %vm2375_vm13  ;;  %vm2306_vm9 = vcmp.ge.s32.totalorder %v3852_v57, 0  ;;  %vm1804_vm1 = vcmp.ge.s32.totalorder %v4245_v47, 12  ;;  %vm5087_vm11 = vcmp.eq.s32.totalorder %v4248_v52, %v2555_v53  ;;  %vm2377_vm3 = vcmp.lt.s32.totalorder %v3851_v56, 8 }
  0x15   :  { %vm2412_vm10 = vmand %vm2340_vm2, %vm2376_vm15  ;;  %v1840_v62 = vsel %vm1804_vm1, 1, %v4146_v16  ;;  %v3766_v63 = vadd.s32 4294967264, %v4238_v23  ;;  %v3797_v0 = vadd.s32 4294967280, %v3765_v58  ;;  %vm5088_vm13 = vcmp.eq.s32.totalorder %v4248_v52, %v2556_v54 }
  0x16   :  { %vm2627_vm12 = vmand %vm2411_vm5, %vm5087_vm11  ;;  %v4147_v1 = vmov 0.0   ;;  %v2521_v3 = vadd.s32 64, %v2485_v59  ;;  %v2522_v4 = vadd.s32 64, %v2486_v60  ;;  %vm1623_vm15 = vcmp.ge.s32.totalorder %v3763_v61, 4 }
  0x17   :  { %vm2628_vm14 = vmand %vm2412_vm10, %vm5088_vm13  ;;  %v2663_v2 = vsel %vm2627_vm12, 1.0, %v4147_v1  ;;  %v1659_v6 = vsel %vm1623_vm15, 1, %v4146_v16  ;;  %vm2378_vm5 = vcmp.lt.s32.totalorder %v3852_v57, 8  ;;  %vm1625_vm11 = vcmp.ge.s32.totalorder %v3797_v0, 4 }
  0x18   :  { %v2664_v5 = vsel %vm2628_vm14, 1.0, %v4147_v1  ;;  %vm2269_vm2 = vmand %vm2197_vm4, %vm2233_vm7  ;;  %v2557_v12 = vadd.s32 %v3851_v56, %v2521_v3  ;;  %v1911_v13 = vmul.u32 4, %v1659_v6  ;;  %v1983_v17 = vmul.u32 2, %v1659_v6 }
  0x19   :  { %vm4267_vm10 = vmand %vm2269_vm2, %vm2305_vm8  ;;  %v2558_v18 = vadd.s32 %v3852_v57, %v2522_v4  ;;  %v1661_v23 = vsel %vm1625_vm11, 1, %v4146_v16  ;;  %v293_v41 = vadd.s32 64, %v4228_v11  ;;  %v294_v45 = vadd.s32 72, %v4228_v11 }
  0x1a   :  { %3999 = vmatmul.mubr.msk.bf16.gmra.mxu0 %vm5086_vm0, %v4122_v7  ;;  %v1876_v7 = vadd.s32 2, %v1840_v62  ;;  %vm2593_vm7 = vcmp.eq.s32.totalorder %v4248_v52, %v2557_v12  ;;  %v1947_v19 = vsub.s32 %v3763_v61, %v1911_v13  ;;  %v3817_v22 = vadd.s32 4294967295, %v1983_v17 }
  0x1b   :  { %4002 = vmatprep.mubr.msk.bf16.mxu0 %vm5086_vm0, %v4123_v8  ;;  %v3798_v8 = vadd.s32 4294967280, %v3766_v63  ;;  %v1913_v28 = vmul.u32 4, %v1661_v23  ;;  %vm2594_vm15 = vcmp.eq.s32.totalorder %v4248_v52, %v2558_v18  ;;  %v1985_v40 = vmul.u32 2, %v1661_v23 }
  0x1c   :  { %v1912_v15 = vmul.u32 4, %v1876_v7  ;;  %v1984_v20 = vmul.u32 2, %v1876_v7  ;;  %vm2199_vm8 = vcmp.ge.s32.totalorder %v3817_v22, 0  ;;  %vm2235_vm12 = vcmp.lt.s32.totalorder %v3817_v22, 8 }
  0x1d   :  { %vm1806_vm4 = vcmp.ge.s32.totalorder %v3798_v8, 12  ;;  %v2091_v26 = vmul.u32 2, %v1947_v19  ;;  %v2487_v32 = vmul.u32 8, %v3817_v22  ;;  %vm4291_vm2 = vmand %vm2199_vm8, %vm2235_vm12  ;;  %v1949_v39 = vsub.s32 %v3797_v0, %v1913_v28 }
  0x1e   :  { %v1948_v21 = vsub.s32 %v4245_v47, %v1912_v15  ;;  %v1842_v24 = vsel %vm1806_vm4, 1, %v4146_v16  ;;  %v3818_v25 = vadd.s32 4294967295, %v1984_v20  ;;  %v3819_v48 = vadd.s32 4294967295, %v1985_v40 }
  0x1f   :  { %v1878_v27 = vadd.s32 2, %v1842_v24  ;;  %v2127_v31 = vadd.s32 1, %v2091_v26  ;;  %v2093_v51 = vmul.u32 2, %v1949_v39  ;;  %v3767_v60 = vadd.s32 4294967232, %v293_v41 }
  0x20   :  { %v2092_v29 = vmul.u32 2, %v1948_v21  ;;  %vm2200_vm13 = vcmp.ge.s32.totalorder %v3818_v25, 0  ;;  %vm2236_vm14 = vcmp.lt.s32.totalorder %v3818_v25, 8  ;;  %v2488_v35 = vmul.u32 8, %v3818_v25 }
  0x21   :  { %v1914_v36 = vmul.u32 4, %v1878_v27  ;;  %v3853_v37 = vadd.s32 4294967295, %v2127_v31  ;;  %v1986_v44 = vmul.u32 2, %v1878_v27  ;;  %v2129_v56 = vadd.s32 1, %v2093_v51 }
  0x22   :  { %4003 = vmatmul.mubr.msk.bf16.gmra.mxu0 %vm5086_vm0, %v4124_v9  ;;  %vm2198_vm0 = vcmp.ge.s32.totalorder %v3816_v55, 0  ;;  %v2699_v9 = vpack.c.bf16 %v2664_v5, %v2663_v2  ;;  %v2128_v34 = vadd.s32 1, %v2092_v29  ;;  %v2489_v58 = vmul.u32 8, %v3819_v48 }
  0x23   :  { %vm2270_vm1 = vmand %vm2198_vm0, %vm2234_vm6  ;;  %v1950_v43 = vsub.s32 %v3798_v8, %v1914_v36  ;;  %vm2379_vm11 = vcmp.lt.s32.totalorder %v3853_v37, 8  ;;  %v2559_v47 = vadd.s32 %v3853_v37, %v2487_v32  ;;  %v4307_v50 = vadd.s32 4294967295, %v1986_v44 }
  0x24   :  { %4022 = vmatprep.mubr.bf16.mxu1 %v2699_v9  ;;  %vm2342_vm0 = vmand %vm2270_vm1, %vm2306_vm9  ;;  %v3854_v42 = vadd.s32 4294967295, %v2128_v34  ;;  %v3768_v61 = vadd.s32 4294967232, %v294_v45  ;;  %v3855_v62 = vadd.s32 4294967295, %v2129_v56  ;;  %v2525_v63 = vadd.s32 64, %v2489_v58 }
  0x25   :  { %vm2413_vm6 = vmand %vm4267_vm10, %vm2377_vm3  ;;  %vm2307_vm10 = vcmp.ge.s32.totalorder %v3853_v37, 0  ;;  %vm2595_vm8 = vcmp.eq.s32.totalorder %v4248_v52, %v2559_v47  ;;  %v2094_v53 = vmul.u32 2, %v1950_v43  ;;  %v2490_v59 = vmul.u32 8, %v4307_v50 }
  0x26   :  { %vm4280_vm9 = vmand %vm2342_vm0, %vm2378_vm5  ;;  %vm2308_vm4 = vcmp.ge.s32.totalorder %v3854_v42, 0  ;;  %vm2380_vm0 = vcmp.lt.s32.totalorder %v3854_v42, 8  ;;  %v2560_v49 = vadd.s32 %v3854_v42, %v2488_v35  ;;  %v295_v0 = vadd.s32 80, %v4228_v11 }
  0x27   :  { %vm4287_vm3 = vmand %vm2413_vm6, %vm2593_vm7  ;;  %v2130_v57 = vadd.s32 1, %v2094_v53  ;;  %v296_v2 = vadd.s32 88, %v4228_v11  ;;  %v2526_v7 = vadd.s32 64, %v2490_v59  ;;  %v2561_v8 = vadd.s32 %v3855_v62, %v2525_v63 }
  0x28   :  { %vm2272_vm1 = vmand %vm2200_vm13, %vm2236_vm14  ;;  %v4313_v54 = vsel %vm4287_vm3, 1.0, %v4147_v1  ;;  %v3769_v15 = vadd.s32 4294967232, %v295_v0  ;;  %v297_v28 = vadd.s32 96, %v4228_v11  ;;  %v298_v30 = vadd.s32 104, %v4228_v11 }
  0x29   :  { %vm4301_vm5 = vmand %vm4280_vm9, %vm2594_vm15  ;;  %vm2596_vm9 = vcmp.eq.s32.totalorder %v4248_v52, %v2560_v49  ;;  %vm2201_vm15 = vcmp.ge.s32.totalorder %v3819_v48, 0  ;;  %v4332_v6 = vadd.s32 4294967295, %v2130_v57  ;;  %v3770_v18 = vadd.s32 4294967232, %v296_v2 }
  0x2a   :  { %vm2343_vm7 = vmand %vm4291_vm2, %vm2307_vm10  ;;  %v4319_v55 = vsel %vm4301_vm5, 1.0, %v4147_v1  ;;  %vm2237_vm2 = vcmp.lt.s32.totalorder %v3819_v48, 8  ;;  %vm1808_vm10 = vcmp.ge.s32.totalorder %v3768_v61, 12  ;;  %v3799_v21 = vadd.s32 4294967280, %v3769_v15 }
  0x2b   :  { %vm2344_vm6 = vmand %vm2272_vm1, %vm2308_vm4  ;;  %vm1627_vm1 = vcmp.ge.s32.totalorder %v3767_v60, 4  ;;  %v2700_v3 = vpack.c.bf16 %v4319_v55, %v4313_v54  ;;  %v1844_v12 = vsel %vm1808_vm10, 1, %v4146_v16  ;;  %vm2202_vm4 = vcmp.ge.s32.totalorder %v4307_v50, 0 }
  0x2c   :  { %vm2415_vm12 = vmand %vm2343_vm7, %vm2379_vm11  ;;  %vm2309_vm11 = vcmp.ge.s32.totalorder %v3855_v62, 0  ;;  %v1663_v9 = vsel %vm1627_vm1, 1, %v4146_v16  ;;  %vm2238_vm7 = vcmp.lt.s32.totalorder %v4307_v50, 8  ;;  %v1880_v17 = vadd.s32 2, %v1844_v12 }
  0x2d   :  { %vm2416_vm13 = vmand %vm2344_vm6, %vm2380_vm0  ;;  %v1915_v13 = vmul.u32 4, %v1663_v9  ;;  %v1987_v14 = vmul.u32 2, %v1663_v9  ;;  %vm2381_vm6 = vcmp.lt.s32.totalorder %v3855_v62, 8  ;;  %v4342_v23 = vadd.s32 %v4332_v6, %v2526_v7 }
  0x2e   :  { %vm2631_vm14 = vmand %vm2415_vm12, %vm2595_vm8  ;;  %v1916_v24 = vmul.u32 4, %v1880_v17  ;;  %v3800_v25 = vadd.s32 4294967280, %v3770_v18  ;;  %vm2597_vm8 = vcmp.eq.s32.totalorder %v4248_v52, %v2561_v8  ;;  %v1988_v26 = vmul.u32 2, %v1880_v17 }
  0x2f   :  { %vm2632_vm3 = vmand %vm2416_vm13, %vm2596_vm9  ;;  %v4327_v4 = vsel %vm2631_vm14, 1.0, %v4147_v1  ;;  %v1951_v19 = vsub.s32 %v3767_v60, %v1915_v13  ;;  %v3821_v20 = vadd.s32 4294967295, %v1987_v14  ;;  %vm1629_vm14 = vcmp.ge.s32.totalorder %v3799_v21, 4 }
  0x30   :  { %v4330_v5 = vsel %vm2632_vm3, 1.0, %v4147_v1  ;;  %vm2273_vm5 = vmand %vm2201_vm15, %vm2237_vm2  ;;  %v1952_v29 = vsub.s32 %v3768_v61, %v1916_v24  ;;  %vm1810_vm15 = vcmp.ge.s32.totalorder %v3800_v25, 12  ;;  %vm2310_vm2 = vcmp.ge.s32.totalorder %v4332_v6, 0 }
  0x31   :  { %vm2345_vm0 = vmand %vm2273_vm5, %vm2309_vm11  ;;  %v2701_v22 = vpack.c.bf16 %v4330_v5, %v4327_v4  ;;  %v2095_v27 = vmul.u32 2, %v1951_v19  ;;  %vm2203_vm9 = vcmp.ge.s32.totalorder %v3821_v20, 0  ;;  %vm2239_vm13 = vcmp.lt.s32.totalorder %v3821_v20, 8 }
  0x32   :  { %vm2417_vm12 = vmand %vm2345_vm0, %vm2381_vm6  ;;  %v2491_v32 = vmul.u32 8, %v3821_v20  ;;  %vm2382_vm1 = vcmp.lt.s32.totalorder %v4332_v6, 8  ;;  %vm2598_vm10 = vcmp.eq.s32.totalorder %v4248_v52, %v4342_v23  ;;  %v2096_v34 = vmul.u32 2, %v1952_v29 }
  0x33   :  { %v2131_v31 = vadd.s32 2, %v2095_v27  ;;  %vm4351_vm3 = vmand %vm2202_vm4, %vm2238_vm7  ;;  %v3822_v36 = vadd.s32 4294967295, %v1988_v26  ;;  %v1665_v38 = vsel %vm1629_vm14, 1, %v4146_v16  ;;  %v1846_v39 = vsel %vm1810_vm15, 1, %v4146_v16 }
  0x34   :  { %vm4361_vm5 = vmand %vm2417_vm12, %vm2597_vm8  ;;  %v2132_v40 = vadd.s32 2, %v2096_v34  ;;  %v1882_v41 = vadd.s32 2, %v1846_v39  ;;  %v1917_v42 = vmul.u32 4, %v1665_v38  ;;  %v1989_v43 = vmul.u32 2, %v1665_v38 }
  0x35   :  { %v3857_v37 = vadd.s32 4294967295, %v2131_v31  ;;  %vm2275_vm11 = vmand %vm2203_vm9, %vm2239_vm13  ;;  %v3771_v45 = vadd.s32 4294967200, %v297_v28  ;;  %v3772_v46 = vadd.s32 4294967200, %v298_v30  ;;  %v4376_v51 = vsel %vm4361_vm5, 1.0, %v4147_v1 }
  0x36   :  { %vm2346_vm7 = vmand %vm4351_vm3, %vm2310_vm2  ;;  %v3858_v47 = vadd.s32 4294967295, %v2132_v40  ;;  %v1918_v48 = vmul.u32 4, %v1882_v41  ;;  %v1953_v49 = vsub.s32 %v3799_v21, %v1917_v42  ;;  %v1990_v50 = vmul.u32 2, %v1882_v41 }
  0x37   :  { %vm2311_vm4 = vcmp.ge.s32.totalorder %v3857_v37, 0  ;;  %v2563_v44 = vadd.s32 %v3857_v37, %v2491_v32  ;;  %vm2383_vm6 = vcmp.lt.s32.totalorder %v3857_v37, 8  ;;  %v2492_v56 = vmul.u32 8, %v3822_v36  ;;  %vm4385_vm13 = vmand %vm2346_vm7, %vm2382_vm1 }
  0x38   :  { %vm4378_vm0 = vmand %vm2275_vm11, %vm2311_vm4  ;;  %v3823_v57 = vadd.s32 4294967295, %v1989_v43  ;;  %vm2204_vm8 = vcmp.ge.s32.totalorder %v3822_v36, 0  ;;  %vm2240_vm12 = vcmp.lt.s32.totalorder %v3822_v36, 8  ;;  %v1954_v58 = vsub.s32 %v3800_v25, %v1918_v48 }
  0x39   :  { %vm2599_vm9 = vcmp.eq.s32.totalorder %v4248_v52, %v2563_v44  ;;  %v3824_v60 = vadd.s32 4294967295, %v1990_v50  ;;  %v2097_v61 = vmul.u32 2, %v1953_v49  ;;  %vm1631_vm14 = vcmp.ge.s32.totalorder %v3771_v45, 4  ;;  %vm2419_vm5 = vmand %vm4378_vm0, %vm2383_vm6 }
  0x3a   :  { %vm1812_vm15 = vcmp.ge.s32.totalorder %v3772_v46, 12  ;;  %vm2312_vm3 = vcmp.ge.s32.totalorder %v3858_v47, 0  ;;  %vm2384_vm2 = vcmp.lt.s32.totalorder %v3858_v47, 8  ;;  %v2098_v62 = vmul.u32 2, %v1954_v58  ;;  %vm4391_vm11 = vmand %vm2204_vm8, %vm2240_vm12 }
  0x3b   :  { %v2493_v63 = vmul.u32 8, %v3823_v57  ;;  %v2564_v2 = vadd.s32 %v3858_v47, %v2492_v56  ;;  %v2133_v6 = vadd.s32 2, %v2097_v61  ;;  %vm2205_vm1 = vcmp.ge.s32.totalorder %v3823_v57, 0  ;;  %vm2634_vm4 = vmand %vm4385_vm13, %vm2598_vm10 }
  0x3c   :  { %v2494_v7 = vmul.u32 8, %v3824_v60  ;;  %v2134_v8 = vadd.s32 2, %v2098_v62  ;;  %vm2241_vm7 = vcmp.lt.s32.totalorder %v3823_v57, 8  ;;  %v1667_v12 = vsel %vm1631_vm14, 1, %v4146_v16  ;;  %vm4404_vm0 = vmand %vm2419_vm5, %vm2599_vm9 }
  0x3d   :  { %v2529_v9 = vadd.s32 64, %v2493_v63  ;;  %v3859_v14 = vadd.s32 4294967295, %v2133_v6  ;;  %vm2206_vm6 = vcmp.ge.s32.totalorder %v3824_v60, 0  ;;  %vm2242_vm8 = vcmp.lt.s32.totalorder %v3824_v60, 8  ;;  %vm4413_vm10 = vmand %vm4391_vm11, %vm2312_vm3 }
  0x3e   :  { %v1848_v15 = vsel %vm1812_vm15, 1, %v4146_v16  ;;  %v3860_v18 = vadd.s32 4294967295, %v2134_v8  ;;  %v1919_v20 = vmul.u32 4, %v1667_v12  ;;  %v1991_v21 = vmul.u32 2, %v1667_v12  ;;  %vm2277_vm12 = vmand %vm2205_vm1, %vm2241_vm7 }
  0x3f   :  { %v1884_v19 = vadd.s32 2, %v1848_v15  ;;  %v4418_v23 = vsel %vm2634_vm4, 1.0, %v4147_v1  ;;  %vm2313_vm9 = vcmp.ge.s32.totalorder %v3859_v14, 0  ;;  %v2530_v24 = vadd.s32 64, %v2494_v7  ;;  %vm2278_vm14 = vmand %vm2206_vm6, %vm2242_vm8 }
  0x40   :  { %v299_v25 = vadd.s32 112, %v4228_v11  ;;  %vm2600_vm13 = vcmp.eq.s32.totalorder %v4248_v52, %v2564_v2  ;;  %vm2314_vm15 = vcmp.ge.s32.totalorder %v3860_v18, 0  ;;  %v2565_v26 = vadd.s32 %v3859_v14, %v2529_v9  ;;  %vm4426_vm3 = vmand %vm4413_vm10, %vm2384_vm2 }
  0x41   :  { %v1920_v27 = vmul.u32 4, %v1884_v19  ;;  %vm2385_vm5 = vcmp.lt.s32.totalorder %v3859_v14, 8  ;;  %v1955_v29 = vsub.s32 %v3771_v45, %v1919_v20  ;;  %v1992_v30 = vmul.u32 2, %v1884_v19  ;;  %vm4430_vm11 = vmand %vm2277_vm12, %vm2313_vm9 }
  0x42   :  { %v2027_v31 = vadd.s32 1, %v1991_v21  ;;  %vm2386_vm1 = vcmp.lt.s32.totalorder %v3860_v18, 8  ;;  %v300_v34 = vadd.s32 120, %v4228_v11  ;;  %v3773_v35 = vadd.s32 4294967200, %v299_v25  ;;  %vm4435_vm4 = vmand %vm2278_vm14, %vm2314_vm15 }
  0x43   :  { %v1956_v33 = vsub.s32 %v3772_v46, %v1920_v27  ;;  %v2566_v37 = vadd.s32 %v3860_v18, %v2530_v24  ;;  %v2028_v38 = vadd.s32 1, %v1992_v30  ;;  %v2099_v40 = vmul.u32 2, %v1955_v29  ;;  %vm4443_vm2 = vmand %vm4426_vm3, %vm2600_vm13  ;;  %v4533_v30 = vld [vmem:[%s5080_s2] ss:$0 sm:$0xff] }
  0x44   :  { %v3825_v39 = vadd.s32 4294967295, %v2027_v31  ;;  %vm2601_vm7 = vcmp.eq.s32.totalorder %v4248_v52, %v2565_v26  ;;  %v3774_v43 = vadd.s32 4294967200, %v300_v34  ;;  %v301_v44 = vadd.s32 128, %v4228_v11  ;;  %vm4452_vm6 = vmand %vm4430_vm11, %vm2385_vm5 }
  0x45   :  { %v2100_v42 = vmul.u32 2, %v1956_v33  ;;  %v3826_v46 = vadd.s32 4294967295, %v2028_v38  ;;  %v3861_v47 = vadd.s32 4294967295, %v2099_v40  ;;  %v3801_v48 = vadd.s32 4294967280, %v3773_v35  ;;  %vm4459_vm10 = vmand %vm4435_vm4, %vm2386_vm1 }
  0x46   :  { %vm2207_vm8 = vcmp.ge.s32.totalorder %v3825_v39, 0  ;;  %vm2243_vm12 = vcmp.lt.s32.totalorder %v3825_v39, 8  ;;  %v2495_v53 = vmul.u32 8, %v3825_v39  ;;  %v302_v56 = vadd.s32 136, %v4228_v11 }
  0x47   :  { %v3862_v50 = vadd.s32 4294967295, %v2100_v42  ;;  %v4467_v57 = vsel %vm4404_vm0, 1.0, %v4147_v1  ;;  %vm2208_vm9 = vcmp.ge.s32.totalorder %v3826_v46, 0  ;;  %vm2244_vm13 = vcmp.lt.s32.totalorder %v3826_v46, 8  ;;  %vm2279_vm14 = vmand %vm2207_vm8, %vm2243_vm12 }
  0x48   :  { %vm2315_vm15 = vcmp.ge.s32.totalorder %v3861_v47, 0  ;;  %v4472_v58 = vsel %vm4443_vm2, 1.0, %v4147_v1  ;;  %vm2602_vm3 = vcmp.eq.s32.totalorder %v4248_v52, %v2566_v37  ;;  %vm2280_vm5 = vmand %vm2208_vm9, %vm2244_vm13  ;;  %v2496_v59 = vmul.u32 8, %v3826_v46 }
  0x49   :  { %vm2316_vm11 = vcmp.ge.s32.totalorder %v3862_v50, 0  ;;  %vm4479_vm0 = vmand %vm4452_vm6, %vm2601_vm7  ;;  %v2567_v61 = vadd.s32 %v3861_v47, %v2495_v53  ;;  %v3802_v62 = vadd.s32 4294967280, %v3774_v43  ;;  %vm1633_vm1 = vcmp.ge.s32.totalorder %v3801_v48, 4 }
  0x4a   :  { %v3775_v63 = vadd.s32 4294967168, %v301_v44  ;;  %vm4483_vm4 = vmand %vm2279_vm14, %vm2315_vm15  ;;  %vm2387_vm2 = vcmp.lt.s32.totalorder %v3861_v47, 8  ;;  %v2568_v2 = vadd.s32 %v3862_v50, %v2496_v59  ;;  %v1669_v6 = vsel %vm1633_vm1, 1, %v4146_v16 }
  0x4b   :  { %v4488_v7 = vadd.s32 4294967168, %v302_v56  ;;  %vm4490_vm8 = vmand %vm2280_vm5, %vm2316_vm11  ;;  %vm2388_vm7 = vcmp.lt.s32.totalorder %v3862_v50, 8  ;;  %vm1814_vm6 = vcmp.ge.s32.totalorder %v3802_v62, 12  ;;  %v1921_v9 = vmul.u32 4, %v1669_v6 }
  0x4c   :  { %v1993_v12 = vmul.u32 2, %v1669_v6  ;;  %vm4498_vm12 = vmand %vm4459_vm10, %vm2602_vm3  ;;  %vm2603_vm9 = vcmp.eq.s32.totalorder %v4248_v52, %v2567_v61  ;;  %v1850_v14 = vsel %vm1814_vm6, 1, %v4146_v16  ;;  %vm1635_vm13 = vcmp.ge.s32.totalorder %v3775_v63, 4 }
  0x4d   :  { %vm1816_vm14 = vcmp.ge.s32.totalorder %v4488_v7, 12  ;;  %vm4508_vm15 = vmand %vm4483_vm4, %vm2387_vm2  ;;  %v1886_v17 = vadd.s32 2, %v1850_v14  ;;  %v1957_v18 = vsub.s32 %v3801_v48, %v1921_v9  ;;  %v1671_v20 = vsel %vm1635_vm13, 1, %v4146_v16 }
  0x4e   :  { %v2029_v19 = vadd.s32 1, %v1993_v12  ;;  %v2702_v21 = vpack.c.bf16 %v4418_v23, %v4376_v51  ;;  %v4518_v24 = vsel %vm4479_vm0, 1.0, %v4147_v1  ;;  %vm2424_vm10 = vmand %vm4490_vm8, %vm2388_vm7  ;;  %vm2604_vm3 = vcmp.eq.s32.totalorder %v4248_v52, %v2568_v2 }
  0x4f   :  { %v1852_v25 = vsel %vm1816_vm14, 1, %v4146_v16  ;;  %v4528_v26 = vsel %vm4498_vm12, 1.0, %v4147_v1  ;;  %v1922_v27 = vmul.u32 4, %v1886_v17  ;;  %v1994_v28 = vmul.u32 2, %v1886_v17  ;;  %vm4541_vm5 = vmand %vm4508_vm15, %vm2603_vm9 }
  0x50   :  { %v3827_v29 = vadd.s32 4294967295, %v2029_v19  ;;  %v2703_v31 = vpack.c.bf16 %v4472_v58, %v4467_v57  ;;  %v2101_v33 = vmul.u32 2, %v1957_v18  ;;  %v4545_v34 = vadd.s32 2, %v1852_v25  ;;  %vm4547_vm11 = vmand %vm2424_vm10, %vm2604_vm3 }
  0x51   :  { %v1923_v35 = vmul.u32 4, %v1671_v20  ;;  %v1958_v37 = vsub.s32 %v3802_v62, %v1922_v27  ;;  %v2030_v38 = vadd.s32 1, %v1994_v28  ;;  %v2704_v40 = vpack.c.bf16 %v4528_v26, %v4518_v24 }
  0x52   :  { %vm2209_vm0 = vcmp.ge.s32.totalorder %v3827_v29, 0  ;;  %vm2245_vm1 = vcmp.lt.s32.totalorder %v3827_v29, 8  ;;  %v3863_v41 = vadd.s32 4294967295, %v2101_v33  ;;  %v2497_v42 = vmul.u32 8, %v3827_v29 }
  0x53   :  { %vm2281_vm4 = vmand %vm2209_vm0, %vm2245_vm1  ;;  %v4554_v43 = vadd.s32 144, %v4228_v11  ;;  %v3828_v45 = vadd.s32 4294967295, %v2030_v38  ;;  %v2102_v46 = vmul.u32 2, %v1958_v37  ;;  %v1995_v47 = vmul.u32 2, %v1671_v20 }
  0x54   :  { %v4560_v49 = vsel %vm4541_vm5, 1.0, %v4147_v1  ;;  %v4565_v50 = vsel %vm4547_vm11, 1.0, %v4147_v1  ;;  %vm2317_vm2 = vcmp.ge.s32.totalorder %v3863_v41, 0  ;;  %v2533_v53 = vadd.s32 64, %v2497_v42 }
  0x55   :  { %v3864_v56 = vadd.s32 4294967295, %v2102_v46  ;;  %vm4567_vm8 = vmand %vm2281_vm4, %vm2317_vm2  ;;  %vm2389_vm7 = vcmp.lt.s32.totalorder %v3863_v41, 8  ;;  %v1924_v60 = vmul.u32 4, %v4545_v34  ;;  %v1959_v61 = vsub.s32 %v3775_v63, %v1923_v35 }
  0x56   :  { %vm2210_vm6 = vcmp.ge.s32.totalorder %v3828_v45, 0  ;;  %vm2246_vm12 = vcmp.lt.s32.totalorder %v3828_v45, 8  ;;  %v2498_v0 = vmul.u32 8, %v3828_v45  ;;  %v2569_v2 = vadd.s32 %v3863_v41, %v2533_v53  ;;  %vm4577_vm15 = vmand %vm4567_vm8, %vm2389_vm7  ;;  %v4125_v53 = vld [vmem:[%s5081_s3] sm:$0xff]  }
  0x57   :  { %vm2282_vm9 = vmand %vm2210_vm6, %vm2246_vm12  ;;  %v2031_v12 = vadd.s32 1, %v1995_v47  ;;  %vm2318_vm13 = vcmp.ge.s32.totalorder %v3864_v56, 0  ;;  %vm2390_vm14 = vcmp.lt.s32.totalorder %v3864_v56, 8  ;;  %v1996_v18 = vmul.u32 2, %v4545_v34  ;;  %4058 = vmatprep.subr.bf16.mxu0 %v4125_v53 }
  0x58   :  { %v2534_v14 = vadd.s32 64, %v2498_v0  ;;  %vm2605_vm10 = vcmp.eq.s32.totalorder %v4248_v52, %v2569_v2  ;;  %vm2354_vm5 = vmand %vm2282_vm9, %vm2318_vm13  ;;  %v1960_v27 = vsub.s32 %v4488_v7, %v1924_v60  ;;  %v2103_v28 = vmul.u32 2, %v1959_v61  ;;  %4059 = vmatpush3.bf16.msra.mxu0 %v4125_v53 }
  0x59   :  { %vm4584_vm0 = vmand %vm2354_vm5, %vm2390_vm14  ;;  %v2705_v33 = vpack.c.bf16 %v4565_v50, %v4560_v49  ;;  %v3829_v7 = vadd.s32 4294967295, %v2031_v12 }
  0x5a   :  { %v2570_v25 = vadd.s32 %v3864_v56, %v2534_v14  ;;  %vm2641_vm4 = vmand %vm4577_vm15, %vm2605_vm10  ;;  %v2104_v46 = vmul.u32 2, %v1960_v27  ;;  %v2139_v47 = vadd.s32 1, %v2103_v28 }
  0x5b   :  { %v4603_v45 = vsel %vm2641_vm4, 1.0, %v4147_v1  ;;  %vm2211_vm9 = vcmp.ge.s32.totalorder %v3829_v7, 0  ;;  %vm2247_vm14 = vcmp.lt.s32.totalorder %v3829_v7, 8 }
  0x5c   :  { %vm2606_vm2 = vcmp.eq.s32.totalorder %v4248_v52, %v2570_v25  ;;  %v3865_v61 = vadd.s32 4294967295, %v2139_v47  ;;  %v2140_v2 = vadd.s32 1, %v2104_v46  ;;  %vm2283_vm15 = vmand %vm2211_vm9, %vm2247_vm14  ;;  %v304_v46 = vadd.s32 152, %v4228_v11 }
  0x5d   :  { %vm2642_vm7 = vmand %vm4584_vm0, %vm2606_vm2 }
  0x5e   :  { %vm2319_vm10 = vcmp.ge.s32.totalorder %v3865_v61, 0  ;;  %v4631_v27 = vadd.s32 4294967295, %v2140_v2 }
  0x5f   :  { %vm2355_vm5 = vmand %vm2283_vm15, %vm2319_vm10 }
  0x60   :  { %vm2392_vm14 = vcmp.lt.s32.totalorder %v4631_v27, 8 }
  0xca   :  { %v3992_v39 = vpop.f32.mrf.mxu0 }
  0xcb   :  { %v174_v44 = vadd.f32 %v3992_v39, %v4533_v30  ;;  %v2032_v39 = vadd.s32 1, %v1996_v18 }
  0xcc   :  { %v165_v48 = vpop.f32.mrf.mxu0 }
  0xcd   :  { %v246_v6 = vmul.f32 0.2, %v174_v44  ;;  %v166_v8 = vadd.f32 %v4533_v30, %v165_v48  ;;  %vm230_vm3 = vcmp.gt.f32.partialorder %v174_v44, 0.0  ;;  %v4607_v48 = vsel %vm2642_vm7, 1.0, %v4147_v1 }
  0xce   :  { %v3993_v62 = vpop.f32.mrf.mxu0 }
  0xcf   :  { %v177_v9 = vadd.f32 %v3993_v62, %v4533_v30  ;;  %vm228_vm1 = vcmp.gt.f32.partialorder %v166_v8, 0.0  ;;  %v244_v29 = vmul.f32 0.2, %v166_v8  ;;  %v262_v36 = vsel %vm230_vm3, %v174_v44, %v246_v6 }
  0xd0   :  { %v168_v13 = vpop.f32.mrf.mxu0 }
  0xd1   :  { %v247_v15 = vmul.f32 0.2, %v177_v9  ;;  %v169_v17 = vadd.f32 %v4533_v30, %v168_v13  ;;  %vm231_vm11 = vcmp.gt.f32.partialorder %v177_v9, 0.0  ;;  %v260_v12 = vsel %vm228_vm1, %v166_v8, %v244_v29 }
  0xd2   :  { %v3996_v19 = vpop.f32.mrf.mxu0  ;;  %v4617_v13 = vadd.s32 4294967295, %v2032_v39  ;;  %v2499_v29 = vmul.u32 8, %v3829_v7  ;;  %v3777_v7 = vadd.s32 4294967168, %v4554_v43 }
  0xd3   :  { %v190_v32 = vadd.f32 %v3996_v19, %v4533_v30  ;;  %v245_v34 = vmul.f32 0.2, %v169_v17  ;;  %vm229_vm8 = vcmp.gt.f32.partialorder %v169_v17, 0.0  ;;  %v263_v38 = vsel %vm231_vm11, %v177_v9, %v247_v15 }
  0xd4   :  { %v181_v35 = vpop.f32.mrf.mxu0  ;;  %v4614_v9 = vpack.c.bf16 %v263_v38, %v262_v36  ;;  %vm2391_vm11 = vcmp.lt.s32.totalorder %v3865_v61, 8  ;;  %vm2212_vm1 = vcmp.ge.s32.totalorder %v4617_v13, 0  ;;  %vm2248_vm4 = vcmp.lt.s32.totalorder %v4617_v13, 8 }
  0xd5   :  { %v182_v37 = vadd.f32 %v4533_v30, %v181_v35  ;;  %v250_v41 = vmul.f32 0.2, %v190_v32  ;;  %vm234_vm6 = vcmp.gt.f32.partialorder %v190_v32, 0.0  ;;  %v261_v60 = vsel %vm229_vm8, %v169_v17, %v245_v34  ;;  %vm4642_vm2 = vmand %vm2355_vm5, %vm2391_vm11 }
  0xd6   :  { %v3997_v42 = vpop.f32.mrf.mxu0  ;;  %v4621_v15 = vpack.c.bf16 %v261_v60, %v260_v12  ;;  %v2706_v17 = vpack.c.bf16 %v4607_v48, %v4603_v45  ;;  %v3803_v60 = vadd.s32 4294967280, %v3777_v7 }
  0xd7   :  { %vm232_vm12 = vcmp.gt.f32.partialorder %v182_v37, 0.0  ;;  %v193_v44 = vadd.f32 %v3997_v42, %v4533_v30  ;;  %v248_v56 = vmul.f32 0.2, %v182_v37  ;;  %v266_v14 = vsel %vm234_vm6, %v190_v32, %v250_v41 }
  0xd8   :  { %v184_v59 = vpop.f32.mrf.mxu0  ;;  %v2500_v32 = vmul.u32 8, %v4617_v13  ;;  %v2571_v42 = vadd.s32 %v3865_v61, %v2499_v29  ;;  %vm2320_vm6 = vcmp.ge.s32.totalorder %v4631_v27, 0  ;;  %vm1637_vm15 = vcmp.ge.s32.totalorder %v3803_v60, 4 }
  0xd9   :  { %vm235_vm13 = vcmp.gt.f32.partialorder %v193_v44, 0.0  ;;  %v251_v62 = vmul.f32 0.2, %v193_v44  ;;  %v185_v0 = vadd.f32 %v4533_v30, %v184_v59  ;;  %v4628_v8 = vsel %vm232_vm12, %v182_v37, %v248_v56 }
  0xda   :  { %v4000_v6 = vpop.f32.mrf.mxu0  ;;  %v4651_v56 = vadd.s32 %v4631_v27, %v2500_v32  ;;  %vm2607_vm12 = vcmp.eq.s32.totalorder %v4248_v52, %v2571_v42  ;;  %v3778_v59 = vadd.s32 4294967168, %v304_v46  ;;  %v1673_v32 = vsel %vm1637_vm15, 1, %v4146_v16 }
  0xdb   :  { %v206_v63 = vadd.f32 %v4000_v6, %v4533_v30  ;;  %v249_v18 = vmul.f32 0.2, %v185_v0  ;;  %v267_v20 = vsel %vm235_vm13, %v193_v44, %v251_v62  ;;  %vm233_vm3 = vcmp.gt.f32.partialorder %v185_v0, 0.0  ;;  %vm2643_vm13 = vmand %vm4642_vm2, %vm2607_vm12 }
  0xdc   :  { %v197_v19 = vpop.f32.mrf.mxu0  ;;  %v4637_v37 = vpack.c.bf16 %v267_v20, %v266_v14  ;;  %v3804_v12 = vadd.s32 4294967280, %v3778_v59  ;;  %v4664_v29 = vsel %vm2643_vm13, 1.0, %v4147_v1  ;;  %vm2608_vm11 = vcmp.eq.s32.totalorder %v4248_v52, %v4651_v56  ;;  %vm2284_vm2 = vmand %vm2212_vm1, %vm2248_vm4 }
  0xdd   :  { %v198_v25 = vadd.f32 %v4533_v30, %v197_v19  ;;  %vm238_vm0 = vcmp.gt.f32.partialorder %v206_v63, 0.0  ;;  %v254_v34 = vmul.f32 0.2, %v206_v63  ;;  %v4640_v39 = vsel %vm233_vm3, %v185_v0, %v249_v18 }
  0xde   :  { %v4001_v28 = vpop.f32.mrf.mxu0  ;;  %vm1818_vm3 = vcmp.ge.s32.totalorder %v3804_v12, 12  ;;  %v1925_v41 = vmul.u32 4, %v1673_v32  ;;  %v1997_v42 = vmul.u32 2, %v1673_v32 }
  0xdf   :  { %v252_v35 = vmul.f32 0.2, %v198_v25  ;;  %v209_v36 = vadd.f32 %v4001_v28, %v4533_v30  ;;  %vm236_vm8 = vcmp.gt.f32.partialorder %v198_v25, 0.0  ;;  %v270_v2 = vsel %vm238_vm0, %v206_v63, %v254_v34 }
  0xe0   :  { %v200_v38 = vpop.f32.mrf.mxu0  ;;  %v2033_v59 = vadd.s32 1, %v1997_v42 }
  0xe1   :  { %vm239_vm7 = vcmp.gt.f32.partialorder %v209_v36, 0.0  ;;  %v255_v47 = vmul.f32 0.2, %v209_v36  ;;  %v201_v44 = vadd.f32 %v4533_v30, %v200_v38  ;;  %v268_v6 = vsel %vm236_vm8, %v198_v25, %v252_v35 }
  0xe2   :  { %v4004_v53 = vpop.f32.mrf.mxu0  ;;  %v1854_v38 = vsel %vm1818_vm3, 1, %v4146_v16 }
  0xe3   :  { %vm237_vm9 = vcmp.gt.f32.partialorder %v201_v44, 0.0  ;;  %v253_v61 = vmul.f32 0.2, %v201_v44  ;;  %v222_v62 = vadd.f32 %v4004_v53, %v4533_v30  ;;  %v271_v43 = vsel %vm239_vm7, %v209_v36, %v255_v47  ;;  %vm2356_vm7 = vmand %vm2284_vm2, %vm2320_vm6 }
  0xe4   :  { %v213_v0 = vpop.f32.mrf.mxu0  ;;  %v4661_v28 = vpack.c.bf16 %v271_v43, %v270_v2  ;;  %v1961_v53 = vsub.s32 %v3803_v60, %v1925_v41  ;;  %vm4684_vm4 = vmand %vm2356_vm7, %vm2392_vm14 }
  0xe5   :  { %v258_v14 = vmul.f32 0.2, %v222_v62  ;;  %v214_v18 = vadd.f32 %v4533_v30, %v213_v0  ;;  %vm242_vm10 = vcmp.gt.f32.partialorder %v222_v62, 0.0  ;;  %v269_v19 = vsel %vm237_vm9, %v201_v44, %v253_v61  ;;  %vm4699_vm14 = vmand %vm4684_vm4, %vm2608_vm11 }
  0xe6   :  { %v4005_v20 = vpop.f32.mrf.mxu0  ;;  %v4668_v34 = vpack.c.bf16 %v269_v19, %v268_v6  ;;  %v1890_v44 = vadd.s32 2, %v1854_v38  ;;  %v305_v61 = vadd.s32 160, %v4228_v11  ;;  %v306_v0 = vadd.s32 168, %v4228_v11 }
  0xe7   :  { %vm240_vm5 = vcmp.gt.f32.partialorder %v214_v18, 0.0  ;;  %v256_v63 = vmul.f32 0.2, %v214_v18  ;;  %v225_v25 = vadd.f32 %v4005_v20, %v4533_v30  ;;  %v274_v36 = vsel %vm242_vm10, %v222_v62, %v258_v14 }
  0xe8   :  { %v216_v35 = vpop.f32.mrf.mxu0  ;;  %v1998_v6 = vmul.u32 2, %v1890_v44  ;;  %v3831_v14 = vadd.s32 4294967295, %v2033_v59  ;;  %v2105_v13 = vmul.u32 2, %v1961_v53  ;;  %v3779_v19 = vadd.s32 4294967136, %v305_v61 }
  0xe9   :  { %v259_v46 = vmul.f32 0.2, %v225_v25  ;;  %v217_v7 = vadd.f32 %v4533_v30, %v216_v35  ;;  %vm243_vm0 = vcmp.gt.f32.partialorder %v225_v25, 0.0  ;;  %v272_v47 = vsel %vm240_vm5, %v214_v18, %v256_v63 }
  0xea   :  { %v1926_v30 = vmul.u32 4, %v1890_v44  ;;  %v3780_v20 = vadd.s32 4294967136, %v306_v0  ;;  %v2034_v63 = vadd.s32 1, %v1998_v6  ;;  %vm2213_vm1 = vcmp.ge.s32.totalorder %v3831_v14, 0 }
  0xeb   :  { %vm241_vm8 = vcmp.gt.f32.partialorder %v217_v7, 0.0  ;;  %v257_v62 = vmul.f32 0.2, %v217_v7  ;;  %v275_v43 = vsel %vm243_vm0, %v225_v25, %v259_v46  ;;  %v2141_v35 = vadd.s32 1, %v2105_v13 }
  0xec   :  { %v283_v2 = vpack.c.bf16 %v275_v43, %v274_v36  ;;  %v1962_v32 = vsub.s32 %v3804_v12, %v1926_v30  ;;  %vm2249_vm6 = vcmp.lt.s32.totalorder %v3831_v14, 8  ;;  %v2501_v36 = vmul.u32 8, %v3831_v14 }
  0xed   :  { %v273_v18 = vsel %vm241_vm8, %v217_v7, %v257_v62  ;;  %vm1639_vm12 = vcmp.ge.s32.totalorder %v3779_v19, 4  ;;  %v3832_v38 = vadd.s32 4294967295, %v2034_v63  ;;  %vm1820_vm9 = vcmp.ge.s32.totalorder %v3780_v20, 12  ;;  %vm4689_vm13 = vmand %vm2213_vm1, %vm2249_vm6 }
  0xee   :  { %4006 = vmatprep.subr.bf16.mxu1 %v283_v2  ;;  %v282_v60 = vpack.c.bf16 %v273_v18, %v272_v47  ;;  %v2106_v41 = vmul.u32 2, %v1962_v32  ;;  %v1675_v42 = vsel %vm1639_vm12, 1, %v4146_v16  ;;  %v3867_v12 = vadd.s32 4294967295, %v2141_v35 }
  0xef   :  { %4007 = vmatpush3.bf16.msra.mxu1 %v283_v2  ;;  %v2537_v27 = vadd.s32 64, %v2501_v36  ;;  %v1856_v7 = vsel %vm1820_vm9, 1, %v4146_v16  ;;  %v1927_v47 = vmul.u32 4, %v1675_v42  ;;  %vm2214_vm15 = vcmp.ge.s32.totalorder %v3832_v38, 0 }
  0xf0   :  { %4008 = vmatprep.subr.bf16.mxu1 %v282_v60  ;;  %v2142_v53 = vadd.s32 1, %v2106_v41  ;;  %vm2250_vm10 = vcmp.lt.s32.totalorder %v3832_v38, 8  ;;  %v2502_v59 = vmul.u32 8, %v3832_v38  ;;  %vm2321_vm5 = vcmp.ge.s32.totalorder %v3867_v12, 0 }
  0xf1   :  { %vm4703_vm3 = vmand %vm2214_vm15, %vm2250_vm10  ;;  %vm2393_vm0 = vcmp.lt.s32.totalorder %v3867_v12, 8  ;;  %v2573_v62 = vadd.s32 %v3867_v12, %v2537_v27  ;;  %v1892_v43 = vadd.s32 2, %v1856_v7  ;;  %v1963_v2 = vsub.s32 %v3779_v19, %v1927_v47 }
  0xf2   :  { %v3868_v56 = vadd.s32 4294967295, %v2142_v53  ;;  %vm2357_vm11 = vmand %vm4689_vm13, %vm2321_vm5  ;;  %v2538_v0 = vadd.s32 64, %v2502_v59  ;;  %v1999_v30 = vmul.u32 2, %v1675_v42  ;;  %v307_v18 = vadd.s32 176, %v4228_v11 }
  0xf3   :  { %4009 = vmatpush3.bf16.msra.mxu1 %v282_v60  ;;  %vm2429_vm2 = vmand %vm2357_vm11, %vm2393_vm0  ;;  %vm2609_vm8 = vcmp.eq.s32.totalorder %v4248_v52, %v2573_v62  ;;  %v1928_v6 = vmul.u32 4, %v1892_v43  ;;  %v2000_v14 = vmul.u32 2, %v1892_v43  ;;  %v4720_v19 = vsel %vm4699_vm14, 1.0, %v4147_v1 }
  0xf4   :  { %4010 = vmatprep.subr.bf16.mxu1 %v4661_v28  ;;  %vm2322_vm7 = vcmp.ge.s32.totalorder %v3868_v56, 0  ;;  %vm2394_vm1 = vcmp.lt.s32.totalorder %v3868_v56, 8  ;;  %v2574_v13 = vadd.s32 %v3868_v56, %v2538_v0  ;;  %vm4712_vm4 = vmand %vm2429_vm2, %vm2609_vm8  ;;  %v2035_v32 = vadd.s32 1, %v1999_v30 }
  0xf5   :  { %vm2358_vm6 = vmand %vm4703_vm3, %vm2322_vm7  ;;  %v1964_v63 = vsub.s32 %v3780_v20, %v1928_v6  ;;  %v2036_v25 = vadd.s32 1, %v2000_v14  ;;  %v2107_v35 = vmul.u32 2, %v1963_v2  ;;  %v308_v38 = vadd.s32 184, %v4228_v11 }
  0xf6   :  { %vm2430_vm12 = vmand %vm2358_vm6, %vm2394_vm1  ;;  %vm2610_vm9 = vcmp.eq.s32.totalorder %v4248_v52, %v2574_v13  ;;  %v3833_v36 = vadd.s32 4294967295, %v2035_v32  ;;  %v278_v41 = vpack.c.bf16 %v4640_v39, %v4628_v8  ;;  %v2707_v20 = vpack.c.bf16 %v4720_v19, %v4664_v29 }
  0xf7   :  { %4011 = vmatpush3.bf16.msra.mxu1 %v4661_v28  ;;  %v3781_v28 = vadd.s32 4294967136, %v307_v18  ;;  %vm2646_vm13 = vmand %vm2430_vm12, %vm2610_vm9  ;;  %v3834_v42 = vadd.s32 4294967295, %v2036_v25  ;;  %v2108_v12 = vmul.u32 2, %v1964_v63  ;;  %v2143_v46 = vadd.s32 2, %v2107_v35 }
  0xf8   :  { %4012 = vmatprep.subr.bf16.mxu1 %v4668_v34  ;;  %v4734_v27 = vsel %vm4712_vm4, 1.0, %v4147_v1  ;;  %v4737_v7 = vsel %vm2646_vm13, 1.0, %v4147_v1  ;;  %v309_v47 = vadd.s32 192, %v4228_v11  ;;  %vm2215_vm14 = vcmp.ge.s32.totalorder %v3833_v36, 0 }
  0xf9   :  { %v2144_v8 = vadd.s32 2, %v2108_v12  ;;  %v3869_v39 = vadd.s32 4294967295, %v2143_v46  ;;  %v2503_v44 = vmul.u32 8, %v3833_v36  ;;  %vm2251_vm15 = vcmp.lt.s32.totalorder %v3833_v36, 8 }
  0xfa   :  { %v2504_v53 = vmul.u32 8, %v3834_v42  ;;  %v3782_v59 = vadd.s32 4294967136, %v308_v38  ;;  %v3805_v61 = vadd.s32 4294967280, %v3781_v28  ;;  %v2708_v62 = vpack.c.bf16 %v4737_v7, %v4734_v27  ;;  %vm4747_vm0 = vmand %vm2215_vm14, %vm2251_vm15 }
  0xfb   :  { %4013 = vmatpush3.bf16.msra.mxu1 %v4668_v34  ;;  %v3870_v43 = vadd.s32 4294967295, %v2144_v8  ;;  %vm2216_vm10 = vcmp.ge.s32.totalorder %v3834_v42, 0  ;;  %vm2252_vm3 = vcmp.lt.s32.totalorder %v3834_v42, 8  ;;  %v310_v34 = vadd.s32 200, %v4228_v11 }
  0xfc   :  { %4014 = vmatprep.subr.bf16.mxu1 %v4637_v37  ;;  %v3806_v56 = vadd.s32 4294967280, %v3782_v59  ;;  %vm1641_vm5 = vcmp.ge.s32.totalorder %v3805_v61, 4  ;;  %v3783_v0 = vadd.s32 4294967104, %v309_v47  ;;  %vm2323_vm11 = vcmp.ge.s32.totalorder %v3869_v39, 0  ;;  %vm4754_vm1 = vmand %vm2216_vm10, %vm2252_vm3 }
  0xfd   :  { %vm2395_vm2 = vcmp.lt.s32.totalorder %v3869_v39, 8  ;;  %v2575_v30 = vadd.s32 %v3869_v39, %v2503_v44  ;;  %v2576_v6 = vadd.s32 %v3870_v43, %v2504_v53  ;;  %v1677_v14 = vsel %vm1641_vm5, 1, %v4146_v16  ;;  %vm4761_vm6 = vmand %vm4747_vm0, %vm2323_vm11 }
  0xfe   :  { %vm1822_vm8 = vcmp.ge.s32.totalorder %v3806_v56, 12  ;;  %v3784_v18 = vadd.s32 4294967104, %v310_v34  ;;  %vm1643_vm7 = vcmp.ge.s32.totalorder %v3783_v0, 4  ;;  %vm2324_vm4 = vcmp.ge.s32.totalorder %v3870_v43, 0  ;;  %vm4780_vm10 = vmand %vm4761_vm6, %vm2395_vm2 }
  0xff   :  { %4015 = vmatpush3.bf16.msra.mxu1 %v4637_v37  ;;  %v1858_v37 = vsel %vm1822_vm8, 1, %v4146_v16  ;;  %v1929_v60 = vmul.u32 4, %v1677_v14  ;;  %v2001_v32 = vmul.u32 2, %v1677_v14  ;;  %vm2396_vm12 = vcmp.lt.s32.totalorder %v3870_v43, 8  ;;  %vm4772_vm14 = vmand %vm4754_vm1, %vm2324_vm4 }
 0x100   :  { %4016 = vmatprep.subr.bf16.mxu1 %v278_v41  ;;  %v1894_v25 = vadd.s32 2, %v1858_v37  ;;  %v1679_v35 = vsel %vm1643_vm7, 1, %v4146_v16  ;;  %vm1824_vm9 = vcmp.ge.s32.totalorder %v3784_v18, 12  ;;  %vm2611_vm13 = vcmp.eq.s32.totalorder %v4248_v52, %v2575_v30  ;;  %vm4791_vm3 = vmand %vm4772_vm14, %vm2396_vm12 }
 0x101   :  { %v1965_v36 = vsub.s32 %v3805_v61, %v1929_v60  ;;  %v2037_v38 = vadd.s32 1, %v2001_v32  ;;  %v1860_v28 = vsel %vm1824_vm9, 1, %v4146_v16  ;;  %vm2612_vm15 = vcmp.eq.s32.totalorder %v4248_v52, %v2576_v6  ;;  %vm4800_vm11 = vmand %vm4780_vm10, %vm2611_vm13 }
 0x102   :  { %v1930_v12 = vmul.u32 4, %v1894_v25  ;;  %v2002_v46 = vmul.u32 2, %v1894_v25  ;;  %v4785_v59 = vadd.s32 208, %v4228_v11  ;;  %vm4812_vm8 = vmand %vm4791_vm3, %vm2612_vm15  ;;  %v313_v39 = vadd.s32 224, %v4228_v11 }
 0x103   :  { %4017 = vmatpush3.bf16.msra.mxu1 %v278_v41  ;;  %v1896_v41 = vadd.s32 2, %v1860_v28  ;;  %v3835_v8 = vadd.s32 4294967295, %v2037_v38  ;;  %v2109_v44 = vmul.u32 2, %v1965_v36  ;;  %v1931_v53 = vmul.u32 4, %v1679_v35 }
 0x104   :  { %4018 = vmatprep.subr.bf16.mxu1 %v4614_v9  ;;  %v1966_v61 = vsub.s32 %v3806_v56, %v1930_v12  ;;  %v2038_v34 = vadd.s32 1, %v2002_v46  ;;  %v2003_v14 = vmul.u32 2, %v1679_v35  ;;  %v3785_v5 = vadd.s32 4294967104, %v4785_v59 }
 0x105   :  { %v1932_v2 = vmul.u32 4, %v1896_v41  ;;  %v2145_v13 = vadd.s32 2, %v2109_v44  ;;  %vm2217_vm5 = vcmp.ge.s32.totalorder %v3835_v8, 0  ;;  %vm2253_vm0 = vcmp.lt.s32.totalorder %v3835_v8, 8 }
 0x106   :  { %v2505_v37 = vmul.u32 8, %v3835_v8  ;;  %v2110_v43 = vmul.u32 2, %v1966_v61  ;;  %v1967_v60 = vsub.s32 %v3783_v0, %v1931_v53  ;;  %vm4804_vm2 = vmand %vm2217_vm5, %vm2253_vm0  ;;  %v2039_v38 = vadd.s32 2, %v2003_v14 }
 0x107   :  { %4019 = vmatpush3.bf16.msra.mxu1 %v4614_v9  ;;  %v3836_v9 = vadd.s32 4294967295, %v2038_v34  ;;  %v1968_v32 = vsub.s32 %v3784_v18, %v1932_v2  ;;  %v3871_v63 = vadd.s32 4294967295, %v2145_v13  ;;  %v2004_v36 = vmul.u32 2, %v1896_v41 }
 0x108   :  { %4020 = vmatprep.subr.bf16.mxu1 %v4621_v15  ;;  %v2541_v35 = vadd.s32 64, %v2505_v37  ;;  %v2146_v28 = vadd.s32 2, %v2110_v43  ;;  %v3837_v41 = vadd.s32 4294967295, %v2039_v38  ;;  %v2111_v47 = vmul.u32 2, %v1967_v60 }
 0x109   :  { %vm2218_vm7 = vcmp.ge.s32.totalorder %v3836_v9, 0  ;;  %vm2254_vm1 = vcmp.lt.s32.totalorder %v3836_v9, 8  ;;  %v2506_v0 = vmul.u32 8, %v3836_v9  ;;  %vm2325_vm6 = vcmp.ge.s32.totalorder %v3871_v63, 0 }
 0x10a   :  { %vm4817_vm4 = vmand %vm2218_vm7, %vm2254_vm1  ;;  %vm2397_vm12 = vcmp.lt.s32.totalorder %v3871_v63, 8  ;;  %v2577_v42 = vadd.s32 %v3871_v63, %v2541_v35  ;;  %v2040_v6 = vadd.s32 2, %v2004_v36  ;;  %v3872_v12 = vadd.s32 4294967295, %v2146_v28 }
 0x10b   :  { %4021 = vmatpush3.bf16.msra.mxu1 %v4621_v15  ;;  %vm2361_vm9 = vmand %vm4804_vm2, %vm2325_vm6  ;;  %v2542_v46 = vadd.s32 64, %v2506_v0  ;;  %v2112_v15 = vmul.u32 2, %v1968_v32  ;;  %v312_v44 = vadd.s32 216, %v4228_v11  ;;  %v3873_v61 = vadd.s32 4294967295, %v2111_v47 }
 0x10c   :  { %vm2433_vm13 = vmand %vm2361_vm9, %vm2397_vm12  ;;  %vm2613_vm14 = vcmp.eq.s32.totalorder %v4248_v52, %v2577_v42  ;;  %v3838_v8 = vadd.s32 4294967295, %v2040_v6  ;;  %vm2326_vm15 = vcmp.ge.s32.totalorder %v3872_v12, 0  ;;  %vm2398_vm10 = vcmp.lt.s32.totalorder %v3872_v12, 8 }
 0x10d   :  { %v2578_v53 = vadd.s32 %v3872_v12, %v2542_v46  ;;  %vm2649_vm3 = vmand %vm2433_vm13, %vm2613_vm14  ;;  %v4834_v34 = vsel %vm4800_vm11, 1.0, %v4147_v1  ;;  %v4839_v2 = vsel %vm4812_vm8, 1.0, %v4147_v1  ;;  %v3874_v54 = vadd.s32 4294967295, %v2112_v15 }
 0x10e   :  { %4023 = vmatmul.mubr.bf16.vlgmr.msra.gmra.mxu1 %v2700_v3  ;;  %vm2362_vm5 = vmand %vm4817_vm4, %vm2326_vm15  ;;  %vm2219_vm0 = vcmp.ge.s32.totalorder %v3837_v41, 0  ;;  %vm2220_vm1 = vcmp.ge.s32.totalorder %v3838_v8, 0  ;;  %vm2255_vm6 = vcmp.lt.s32.totalorder %v3837_v41, 8  ;;  %vm2256_vm12 = vcmp.lt.s32.totalorder %v3838_v8, 8 }
 0x10f   :  { %4026 = vmatprep.mubr.bf16.mxu1 %v2701_v22  ;;  %vm2434_vm2 = vmand %vm2362_vm5, %vm2398_vm10  ;;  %vm2614_vm7 = vcmp.eq.s32.totalorder %v4248_v52, %v2578_v53  ;;  %v4845_v55 = vsel %vm2649_vm3, 1.0, %v4147_v1  ;;  %vm2327_vm11 = vcmp.ge.s32.totalorder %v3873_v61, 0  ;;  %vm2328_vm13 = vcmp.ge.s32.totalorder %v3874_v54, 0 }
 0x110   :  { %vm2650_vm9 = vmand %vm2434_vm2, %vm2614_vm7  ;;  %v2507_v3 = vmul.u32 8, %v3837_v41  ;;  %vm2399_vm14 = vcmp.lt.s32.totalorder %v3873_v61, 8  ;;  %v2508_v4 = vmul.u32 8, %v3838_v8  ;;  %v3786_v22 = vadd.s32 4294967104, %v312_v44 }
 0x111   :  { %vm2291_vm8 = vmand %vm2219_vm0, %vm2255_vm6  ;;  %vm2400_vm15 = vcmp.lt.s32.totalorder %v3874_v54, 8  ;;  %v314_v13 = vadd.s32 232, %v4228_v11  ;;  %v4851_v37 = vsel %vm2650_vm9, 1.0, %v4147_v1  ;;  %v3807_v9 = vadd.s32 4294967280, %v3785_v5 }
 0x112   :  { %vm2292_vm4 = vmand %vm2220_vm1, %vm2256_vm12  ;;  %v2579_v14 = vadd.s32 %v3873_v61, %v2507_v3  ;;  %v2580_v56 = vadd.s32 %v3874_v54, %v2508_v4  ;;  %v3808_v43 = vadd.s32 4294967280, %v3786_v22  ;;  %v3787_v59 = vadd.s32 4294967072, %v313_v39 }
 0x113   :  { %vm2363_vm10 = vmand %vm2291_vm8, %vm2327_vm11  ;;  %v3788_v60 = vadd.s32 4294967072, %v314_v13  ;;  %v315_v32 = vadd.s32 240, %v4228_v11  ;;  %vm1645_vm7 = vcmp.ge.s32.totalorder %v3807_v9, 4  ;;  %v316_v63 = vadd.s32 248, %v4228_v11 }
 0x114   :  { %vm2364_vm3 = vmand %vm2292_vm4, %vm2328_vm13  ;;  %vm2615_vm5 = vcmp.eq.s32.totalorder %v4248_v52, %v2579_v14  ;;  %vm2616_vm2 = vcmp.eq.s32.totalorder %v4248_v52, %v2580_v56  ;;  %vm1826_vm1 = vcmp.ge.s32.totalorder %v3808_v43, 12  ;;  %v1681_v25 = vsel %vm1645_vm7, 1, %v4146_v16 }
 0x115   :  { %vm2435_vm0 = vmand %vm2363_vm10, %vm2399_vm14  ;;  %v1862_v35 = vsel %vm1826_vm1, 1, %v4146_v16  ;;  %vm1647_vm12 = vcmp.ge.s32.totalorder %v3787_v59, 4  ;;  %vm1828_vm9 = vcmp.ge.s32.totalorder %v3788_v60, 12  ;;  %v1933_v23 = vmul.u32 4, %v1681_v25 }
 0x116   :  { %4027 = vmatmul.mubr.bf16.gmra.mxu1 %v2702_v21  ;;  %vm2436_vm6 = vmand %vm2364_vm3, %vm2400_vm15  ;;  %v1898_v51 = vadd.s32 2, %v1862_v35  ;;  %v2005_v21 = vmul.u32 2, %v1681_v25  ;;  %v1683_v36 = vsel %vm1647_vm12, 1, %v4146_v16  ;;  %v1864_v57 = vsel %vm1828_vm9, 1, %v4146_v16 }
 0x117   :  { %4030 = vmatprep.mubr.bf16.mxu1 %v2703_v31  ;;  %vm2651_vm11 = vmand %vm2435_vm0, %vm2615_vm5  ;;  %v1935_v58 = vmul.u32 4, %v1683_v36  ;;  %v2007_v31 = vmul.u32 2, %v1683_v36  ;;  %v3789_v38 = vadd.s32 4294967072, %v315_v32  ;;  %v1969_v0 = vsub.s32 %v3807_v9, %v1933_v23 }
 0x118   :  { %vm2652_vm13 = vmand %vm2436_vm6, %vm2616_vm2  ;;  %v4875_v30 = vsel %vm2651_vm11, 1.0, %v4147_v1  ;;  %v1934_v28 = vmul.u32 4, %v1898_v51  ;;  %v2006_v18 = vmul.u32 2, %v1898_v51  ;;  %v2041_v6 = vadd.s32 2, %v2005_v21 }
 0x119   :  { %v4878_v42 = vsel %vm2652_vm13, 1.0, %v4147_v1  ;;  %v1900_v12 = vadd.s32 2, %v1864_v57  ;;  %v1971_v46 = vsub.s32 %v3787_v59, %v1935_v58  ;;  %v2113_v8 = vmul.u32 2, %v1969_v0 }
 0x11a   :  { %v1970_v41 = vsub.s32 %v3808_v43, %v1934_v28  ;;  %v2042_v47 = vadd.s32 2, %v2006_v18  ;;  %v2043_v15 = vadd.s32 2, %v2007_v31  ;;  %v3839_v44 = vadd.s32 4294967295, %v2041_v6 }
 0x11b   :  { %v1936_v53 = vmul.u32 4, %v1900_v12  ;;  %v2008_v61 = vmul.u32 2, %v1900_v12  ;;  %v3790_v54 = vadd.s32 4294967072, %v316_v63  ;;  %v3875_v5 = vadd.s32 4294967295, %v2113_v8 }
 0x11c   :  { %v3840_v3 = vadd.s32 4294967295, %v2042_v47  ;;  %v2114_v4 = vmul.u32 2, %v1970_v41  ;;  %v3841_v22 = vadd.s32 4294967295, %v2043_v15  ;;  %vm2221_vm8 = vcmp.ge.s32.totalorder %v3839_v44, 0 }
 0x11d   :  { %vm2257_vm14 = vcmp.lt.s32.totalorder %v3839_v44, 8  ;;  %v2509_v14 = vmul.u32 8, %v3839_v44  ;;  %v1972_v39 = vsub.s32 %v3788_v60, %v1936_v53  ;;  %vm2329_vm3 = vcmp.ge.s32.totalorder %v3875_v5, 0 }
 0x11e   :  { %4031 = vmatmul.mubr.bf16.gmra.mxu1 %v2704_v40  ;;  %v3876_v13 = vadd.s32 4294967295, %v2114_v4  ;;  %vm2222_vm4 = vcmp.ge.s32.totalorder %v3840_v3, 0  ;;  %vm2258_vm15 = vcmp.lt.s32.totalorder %v3840_v3, 8  ;;  %vm2293_vm10 = vmand %vm2221_vm8, %vm2257_vm14  ;;  %vm2401_vm0 = vcmp.lt.s32.totalorder %v3875_v5, 8 }
 0x11f   :  { %4034 = vmatprep.mubr.bf16.mxu1 %v2705_v33  ;;  %vm2294_vm5 = vmand %vm2222_vm4, %vm2258_vm15  ;;  %v2510_v24 = vmul.u32 8, %v3840_v3  ;;  %v2545_v26 = vadd.s32 64, %v2509_v14  ;;  %v2044_v40 = vadd.s32 2, %v2008_v61  ;;  %v2115_v56 = vmul.u32 2, %v1971_v46 }
 0x120   :  { %vm2330_vm2 = vcmp.ge.s32.totalorder %v3876_v13, 0  ;;  %vm2365_vm7 = vmand %vm2293_vm10, %vm2329_vm3  ;;  %vm2402_vm1 = vcmp.lt.s32.totalorder %v3876_v13, 8  ;;  %v2116_v49 = vmul.u32 2, %v1972_v39  ;;  %vm2223_vm12 = vcmp.ge.s32.totalorder %v3841_v22, 0 }
 0x121   :  { %vm2366_vm6 = vmand %vm2294_vm5, %vm2330_vm2  ;;  %v2546_v50 = vadd.s32 64, %v2510_v24  ;;  %v2581_v33 = vadd.s32 %v3875_v5, %v2545_v26  ;;  %v3842_v9 = vadd.s32 4294967295, %v2044_v40  ;;  %v2151_v43 = vadd.s32 1, %v2115_v56 }
 0x122   :  { %vm2437_vm9 = vmand %vm2365_vm7, %vm2401_vm0  ;;  %v2152_v59 = vadd.s32 1, %v2116_v49  ;;  %vm2259_vm11 = vcmp.lt.s32.totalorder %v3841_v22, 8  ;;  %v2511_v60 = vmul.u32 8, %v3841_v22  ;;  %v3809_v21 = vadd.s32 4294967280, %v3789_v38 }
 0x123   :  { %vm4886_vm13 = vmand %vm2366_vm6, %vm2402_vm1  ;;  %v2582_v63 = vadd.s32 %v3876_v13, %v2546_v50  ;;  %vm2617_vm8 = vcmp.eq.s32.totalorder %v4248_v52, %v2581_v33  ;;  %vm2224_vm14 = vcmp.ge.s32.totalorder %v3842_v9, 0  ;;  %vm2260_vm4 = vcmp.lt.s32.totalorder %v3842_v9, 8 }
 0x124   :  { %vm4894_vm15 = vmand %vm2437_vm9, %vm2617_vm8  ;;  %v3877_v35 = vadd.s32 4294967295, %v2151_v43  ;;  %v3878_v51 = vadd.s32 4294967295, %v2152_v59  ;;  %v2512_v23 = vmul.u32 8, %v3842_v9  ;;  %v2709_v36 = vpack.c.bf16 %v4839_v2, %v4834_v34 }
 0x125   :  { %v2710_v57 = vpack.c.bf16 %v4851_v37, %v4845_v55  ;;  %vm2618_vm10 = vcmp.eq.s32.totalorder %v4248_v52, %v2582_v63  ;;  %vm2295_vm3 = vmand %vm2223_vm12, %vm2259_vm11  ;;  %v3810_v45 = vadd.s32 4294967280, %v3790_v54  ;;  %v2711_v48 = vpack.c.bf16 %v4878_v42, %v4875_v30 }
 0x126   :  { %4035 = vmatmul.mubr.bf16.gmra.mxu1 %v2706_v17  ;;  %vm4912_vm5 = vmand %vm4886_vm13, %vm2618_vm10  ;;  %vm2331_vm0 = vcmp.ge.s32.totalorder %v3877_v35, 0  ;;  %vm2332_vm2 = vcmp.ge.s32.totalorder %v3878_v51, 0  ;;  %v317_v29 = vadd.s32 256, %v4228_v11  ;;  %vm2403_vm1 = vcmp.lt.s32.totalorder %v3877_v35, 8 }
 0x127   :  { %4038 = vmatprep.mubr.bf16.mxu1 %v2707_v20  ;;  %vm2296_vm7 = vmand %vm2224_vm14, %vm2260_vm4  ;;  %v2583_v19 = vadd.s32 %v3877_v35, %v2511_v60  ;;  %v2584_v20 = vadd.s32 %v3878_v51, %v2512_v23  ;;  %vm1649_vm6 = vcmp.ge.s32.totalorder %v3809_v21, 4  ;;  %vm2404_vm9 = vcmp.lt.s32.totalorder %v3878_v51, 8 }
 0x128   :  { %vm2367_vm12 = vmand %vm2295_vm3, %vm2331_vm0  ;;  %v1685_v34 = vsel %vm1649_vm6, 1, %v4146_v16  ;;  %vm1830_vm11 = vcmp.ge.s32.totalorder %v3810_v45, 12  ;;  %v318_v2 = vadd.s32 264, %v4228_v11  ;;  %v3791_v0 = vadd.s32 4294967040, %v317_v29 }
 0x129   :  { %vm2368_vm13 = vmand %vm2296_vm7, %vm2332_vm2  ;;  %vm2619_vm8 = vcmp.eq.s32.totalorder %v4248_v52, %v2583_v19  ;;  %vm2620_vm10 = vcmp.eq.s32.totalorder %v4248_v52, %v2584_v20  ;;  %v1866_v58 = vsel %vm1830_vm11, 1, %v4146_v16  ;;  %v1937_v31 = vmul.u32 4, %v1685_v34 }
 0x12a   :  { %vm2439_vm14 = vmand %vm2367_vm12, %vm2403_vm1  ;;  %v1902_v38 = vadd.s32 2, %v1866_v58  ;;  %v2009_v28 = vmul.u32 2, %v1685_v34  ;;  %v3792_v18 = vadd.s32 4294967040, %v318_v2  ;;  %v4927_v6 = vsel %vm4894_vm15, 1.0, %v4147_v1 }
 0x12b   :  { %v4932_v12 = vsel %vm4912_vm5, 1.0, %v4147_v1  ;;  %vm2440_vm4 = vmand %vm2368_vm13, %vm2404_vm9  ;;  %v1973_v46 = vsub.s32 %v3809_v21, %v1937_v31  ;;  %v319_v41 = vadd.s32 272, %v4228_v11  ;;  %vm1651_vm15 = vcmp.ge.s32.totalorder %v3791_v0, 4 }
 0x12c   :  { %vm2655_vm3 = vmand %vm2439_vm14, %vm2619_vm8  ;;  %v1938_v47 = vmul.u32 4, %v1902_v38  ;;  %v2010_v8 = vmul.u32 2, %v1902_v38  ;;  %v2045_v15 = vadd.s32 2, %v2009_v28  ;;  %v1687_v53 = vsel %vm1651_vm15, 1, %v4146_v16 }
 0x12d   :  { %vm2656_vm5 = vmand %vm2440_vm4, %vm2620_vm10  ;;  %v2117_v44 = vmul.u32 2, %v1973_v46  ;;  %vm1832_vm0 = vcmp.ge.s32.totalorder %v3792_v18, 12  ;;  %v320_v61 = vadd.s32 280, %v4228_v11  ;;  %v4946_v27 = vsel %vm2655_vm3, 1.0, %v4147_v1 }
 0x12e   :  { %4039 = vmatmul.mubr.bf16.gmra.mxu1 %v2708_v62  ;;  %v1974_v7 = vsub.s32 %v3810_v45, %v1938_v47  ;;  %v2046_v62 = vadd.s32 2, %v2010_v8  ;;  %v3843_v54 = vadd.s32 4294967295, %v2045_v15  ;;  %v4949_v3 = vsel %vm2656_vm5, 1.0, %v4147_v1 }
 0x12f   :  { %4042 = vmatprep.mubr.bf16.mxu1 %v2709_v36  ;;  %v2153_v4 = vadd.s32 1, %v2117_v44  ;;  %v1868_v5 = vsel %vm1832_vm0, 1, %v4146_v16  ;;  %v1939_v22 = vmul.u32 4, %v1687_v53  ;;  %v2011_v32 = vmul.u32 2, %v1687_v53 }
 0x130   :  { %v3844_v14 = vadd.s32 4294967295, %v2046_v62  ;;  %v2118_v39 = vmul.u32 2, %v1974_v7  ;;  %vm2225_vm2 = vcmp.ge.s32.totalorder %v3843_v54, 0  ;;  %vm2261_vm7 = vcmp.lt.s32.totalorder %v3843_v54, 8 }
 0x131   :  { %v3879_v13 = vadd.s32 4294967295, %v2153_v4  ;;  %vm4952_vm1 = vmand %vm2225_vm2, %vm2261_vm7  ;;  %v2513_v26 = vmul.u32 8, %v3843_v54  ;;  %v1904_v40 = vadd.s32 2, %v1868_v5  ;;  %v1975_v56 = vsub.s32 %v3791_v0, %v1939_v22 }
 0x132   :  { %v2154_v49 = vadd.s32 1, %v2118_v39  ;;  %vm2226_vm6 = vcmp.ge.s32.totalorder %v3844_v14, 0  ;;  %vm2262_vm12 = vcmp.lt.s32.totalorder %v3844_v14, 8  ;;  %v2514_v50 = vmul.u32 8, %v3844_v14 }
 0x133   :  { %vm4956_vm9 = vmand %vm2226_vm6, %vm2262_vm12  ;;  %vm2333_vm11 = vcmp.ge.s32.totalorder %v3879_v13, 0  ;;  %vm2405_vm13 = vcmp.lt.s32.totalorder %v3879_v13, 8  ;;  %v2549_v9 = vadd.s32 64, %v2513_v26  ;;  %v1940_v43 = vmul.u32 4, %v1904_v40 }
 0x134   :  { %v3880_v59 = vadd.s32 4294967295, %v2154_v49  ;;  %vm2369_vm8 = vmand %vm4952_vm1, %vm2333_vm11  ;;  %v2550_v60 = vadd.s32 64, %v2514_v50  ;;  %v2012_v63 = vmul.u32 2, %v1904_v40  ;;  %v2119_v51 = vmul.u32 2, %v1975_v56 }
 0x135   :  { %v2585_v25 = vadd.s32 %v3879_v13, %v2549_v9  ;;  %v1976_v35 = vsub.s32 %v3792_v18, %v1940_v43  ;;  %v3793_v23 = vadd.s32 4294967040, %v319_v41  ;;  %vm2441_vm4 = vmand %vm2369_vm8, %vm2405_vm13  ;;  %v2047_v37 = vadd.s32 2, %v2011_v32  ;;  %v4126_v32 = vld [vmem:[%s5081_s3 + $0x8] sm:$0xff]  }
 0x136   :  { %4043 = vmatmul.mubr.bf16.gmra.mxu1 %v2710_v57  ;;  %vm2334_vm10 = vcmp.ge.s32.totalorder %v3880_v59, 0  ;;  %vm2406_vm14 = vcmp.lt.s32.totalorder %v3880_v59, 8  ;;  %v2586_v55 = vadd.s32 %v3880_v59, %v2550_v60  ;;  %v2048_v21 = vadd.s32 2, %v2012_v63  ;;  %4064 = vmatprep.subr.bf16.mxu0 %v4126_v32 }
 0x137   :  { %4046 = vmatprep.mubr.bf16.mxu1 %v2711_v48  ;;  %vm2370_vm3 = vmand %vm4956_vm9, %vm2334_vm10  ;;  %vm2621_vm15 = vcmp.eq.s32.totalorder %v4248_v52, %v2585_v25  ;;  %v2120_v36 = vmul.u32 2, %v1976_v35  ;;  %v2155_v57 = vadd.s32 2, %v2119_v51  ;;  %v2712_v30 = vpack.c.bf16 %v4932_v12, %v4927_v6 }
 0x138   :  { %v2713_v42 = vpack.c.bf16 %v4949_v3, %v4946_v27  ;;  %vm2442_vm5 = vmand %vm2370_vm3, %vm2406_vm14  ;;  %vm2622_vm0 = vcmp.eq.s32.totalorder %v4248_v52, %v2586_v55  ;;  %v3845_v45 = vadd.s32 4294967295, %v2047_v37  ;;  %v3846_v48 = vadd.s32 4294967295, %v2048_v21 }
 0x139   :  { %vm2657_vm2 = vmand %vm2441_vm4, %vm2621_vm15  ;;  %v2156_v17 = vadd.s32 2, %v2120_v36  ;;  %v3881_v29 = vadd.s32 4294967295, %v2155_v57  ;;  %v3794_v19 = vadd.s32 4294967040, %v320_v61  ;;  %v3811_v34 = vadd.s32 4294967280, %v3793_v23 }
 0x13a   :  { %vm2658_vm7 = vmand %vm2442_vm5, %vm2622_vm0  ;;  %vm2227_vm1 = vcmp.ge.s32.totalorder %v3845_v45, 0  ;;  %vm2263_vm6 = vcmp.lt.s32.totalorder %v3845_v45, 8  ;;  %v2515_v20 = vmul.u32 8, %v3845_v45  ;;  %v2693_v2 = vsel %vm2657_vm2, 1.0, %v4147_v1  ;;  %v4128_v45 = vld [vmem:[%s5081_s3 + $0x18] sm:$0xff]  }
 0x13b   :  { %v3882_v58 = vadd.s32 4294967295, %v2156_v17  ;;  %vm2228_vm12 = vcmp.ge.s32.totalorder %v3846_v48, 0  ;;  %vm2264_vm9 = vcmp.lt.s32.totalorder %v3846_v48, 8  ;;  %vm2299_vm11 = vmand %vm2227_vm1, %vm2263_vm6  ;;  %v2694_v31 = vsel %vm2658_vm7, 1.0, %v4147_v1 }
 0x13c   :  { %vm2300_vm13 = vmand %vm2228_vm12, %vm2264_vm9  ;;  %vm2335_vm8 = vcmp.ge.s32.totalorder %v3881_v29, 0  ;;  %vm2407_vm10 = vcmp.lt.s32.totalorder %v3881_v29, 8  ;;  %v2516_v38 = vmul.u32 8, %v3846_v48  ;;  %v2587_v28 = vadd.s32 %v3881_v29, %v2515_v20 }
 0x13d   :  { %vm2336_vm14 = vcmp.ge.s32.totalorder %v3882_v58, 0  ;;  %vm2371_vm4 = vmand %vm2299_vm11, %vm2335_vm8  ;;  %vm2408_vm3 = vcmp.lt.s32.totalorder %v3882_v58, 8  ;;  %v3812_v0 = vadd.s32 4294967280, %v3794_v19  ;;  %vm1653_vm5 = vcmp.ge.s32.totalorder %v3811_v34, 4 }
 0x13e   :  { %4047 = vmatmul.mubr.bf16.gmra.mxu1 %v2712_v30  ;;  %vm2372_vm15 = vmand %vm2300_vm13, %vm2336_vm14  ;;  %v2588_v18 = vadd.s32 %v3882_v58, %v2516_v38  ;;  %v2714_v6 = vpack.c.bf16 %v2694_v31, %v2693_v2  ;;  %vm2623_vm2 = vcmp.eq.s32.totalorder %v4248_v52, %v2587_v28  ;;  %v1689_v12 = vsel %vm1653_vm5, 1, %v4146_v16  ;;  %v4129_v2 = vld [vmem:[%s5081_s3 + $0x20] sm:$0xff]  }
 0x13f   :  { %4050 = vmatprep.mubr.bf16.mxu1 %v2713_v42  ;;  %vm2443_vm0 = vmand %vm2371_vm4, %vm2407_vm10  ;;  %vm1834_vm7 = vcmp.ge.s32.totalorder %v3812_v0, 12  ;;  %v1941_v41 = vmul.u32 4, %v1689_v12  ;;  %v2013_v47 = vmul.u32 2, %v1689_v12 }
 0x140   :  { %vm2444_vm1 = vmand %vm2372_vm15, %vm2408_vm3  ;;  %vm2624_vm6 = vcmp.eq.s32.totalorder %v4248_v52, %v2588_v18  ;;  %v1870_v46 = vsel %vm1834_vm7, 1, %v4146_v16 }
 0x141   :  { %vm2659_vm12 = vmand %vm2443_vm0, %vm2623_vm2  ;;  %v1906_v8 = vadd.s32 2, %v1870_v46  ;;  %v1977_v44 = vsub.s32 %v3811_v34, %v1941_v41  ;;  %v2049_v53 = vadd.s32 2, %v2013_v47 }
 0x142   :  { %vm2660_vm9 = vmand %vm2444_vm1, %vm2624_vm6  ;;  %v2695_v15 = vsel %vm2659_vm12, 1.0, %v4147_v1 }
 0x143   :  { %v2696_v61 = vsel %vm2660_vm9, 1.0, %v4147_v1  ;;  %v1942_v27 = vmul.u32 4, %v1906_v8  ;;  %v2014_v7 = vmul.u32 2, %v1906_v8  ;;  %v3847_v54 = vadd.s32 4294967295, %v2049_v53 }
 0x144   :  { %v2715_v62 = vpack.c.bf16 %v2696_v61, %v2695_v15  ;;  %v2121_v3 = vmul.u32 2, %v1977_v44  ;;  %v4131_v44 = vld [vmem:[%s5081_s3 + $0x30] sm:$0xff]  }
 0x145   :  { %v1978_v4 = vsub.s32 %v3812_v0, %v1942_v27  ;;  %v2050_v5 = vadd.s32 2, %v2014_v7  ;;  %vm2229_vm11 = vcmp.ge.s32.totalorder %v3847_v54, 0  ;;  %vm2265_vm13 = vcmp.lt.s32.totalorder %v3847_v54, 8 }
 0x146   :  { %4051 = vmatmul.mubr.bf16.gmra.mxu1 %v2714_v6  ;;  %v2157_v22 = vadd.s32 2, %v2121_v3  ;;  %v2517_v14 = vmul.u32 8, %v3847_v54  ;;  %vm2301_vm8 = vmand %vm2229_vm11, %vm2265_vm13  ;;  %v4130_v6 = vld [vmem:[%s5081_s3 + $0x28] sm:$0xff]   ;;  %v4132_v3 = vld [vmem:[%s5081_s3 + $0x38] sm:$0xff]  }
 0x147   :  { %4054 = vmatprep.mubr.bf16.mxu1 %v2715_v62  ;;  %v3848_v39 = vadd.s32 4294967295, %v2050_v5  ;;  %v2122_v13 = vmul.u32 2, %v1978_v4 }
 0x148   :  { %v3883_v24 = vadd.s32 4294967295, %v2157_v22  ;;  %v2553_v26 = vadd.s32 64, %v2517_v14 }
 0x149   :  { %v2158_v40 = vadd.s32 2, %v2122_v13  ;;  %vm2230_vm10 = vcmp.ge.s32.totalorder %v3848_v39, 0  ;;  %vm2266_vm14 = vcmp.lt.s32.totalorder %v3848_v39, 8  ;;  %v2518_v56 = vmul.u32 8, %v3848_v39 }
 0x14a   :  { %vm2302_vm4 = vmand %vm2230_vm10, %vm2266_vm14  ;;  %vm2337_vm3 = vcmp.ge.s32.totalorder %v3883_v24, 0  ;;  %vm2409_vm15 = vcmp.lt.s32.totalorder %v3883_v24, 8  ;;  %v2589_v49 = vadd.s32 %v3883_v24, %v2553_v26  ;;  %v4133_v24 = vld [vmem:[%s5081_s3 + $0x40] sm:$0xff]  }
 0x14b   :  { %v3884_v50 = vadd.s32 4294967295, %v2158_v40  ;;  %vm2373_vm5 = vmand %vm2301_vm8, %vm2337_vm3  ;;  %v2554_v33 = vadd.s32 64, %v2518_v56  ;;  %vm2937_vm8 = vcmask 130048  }
 0x14c   :  { %vm2445_vm0 = vmand %vm2373_vm5, %vm2409_vm15  ;;  %vm2625_vm2 = vcmp.eq.s32.totalorder %v4248_v52, %v2589_v49  ;;  %vm5187_vm15 = vcmask 261120  }
 0x14d   :  { %vm2338_vm7 = vcmp.ge.s32.totalorder %v3884_v50, 0  ;;  %vm2410_vm1 = vcmp.lt.s32.totalorder %v3884_v50, 8  ;;  %v2590_v9 = vadd.s32 %v3884_v50, %v2554_v33  ;;  %vm2661_vm6 = vmand %vm2445_vm0, %vm2625_vm2 }
 0x14e   :  { %vm2374_vm12 = vmand %vm2302_vm4, %vm2338_vm7  ;;  %v2697_v43 = vsel %vm2661_vm6, 1.0, %v4147_v1  ;;  %vm3737_vm6 = vcmp.lt.s32.totalorder %v284_v10, 512 }
 0x14f   :  { %vm2446_vm9 = vmand %vm2374_vm12, %vm2410_vm1  ;;  %vm2626_vm11 = vcmp.eq.s32.totalorder %v4248_v52, %v2590_v9 }
 0x150   :  { %vm2662_vm13 = vmand %vm2446_vm9, %vm2626_vm11 }
 0x151   :  { %v2698_v59 = vsel %vm2662_vm13, 1.0, %v4147_v1  ;;  %v4127_v1 = vld [vmem:[%s5081_s3 + $0x10] sm:$0xff]   ;;  %vm5188_vm5 = vmmov %vm5187_vm15 }
 0x152   :  { %v2716_v60 = vpack.c.bf16 %v2698_v59, %v2697_v43  ;;  %vm5189_vm0 = vmmov %vm5188_vm5 }
 0x153   :  { %vm5190_vm2 = vmmov %vm5189_vm0 }
 0x154   :  { %4055 = vmatmul.mubr.bf16.gmra.mxu1 %v2716_v60  ;;  %vm5191_vm7 = vmmov %vm5189_vm0 }
 0x155   :  { %3656 = vmatprep.mubr.bf16.mxu1 %v4146_v16  ;;  %vm5192_vm1 = vmmov %vm5189_vm0 }
 0x1ce   :  { %v4024_v63 = vpop.f32.mrf.mxu1 }
 0x1d0   :  { %v2751_v25 = vpop.f32.mrf.mxu1 }
 0x1d2   :  { %v4025_v35 = vpop.f32.mrf.mxu1 }
 0x1d3   :  { %v2895_v23 = vpack.c.bf16 %v4025_v35, %v4024_v63  ;;  %v4134_v63 = vld [vmem:[%s5082_s5 + $0x20] ss:$16 sps:$4 sm:$0xff]  }
 0x1d4   :  { %v2754_v51 = vpop.f32.mrf.mxu1  ;;  %v4137_v35 = vld [vmem:[%s5082_s5] ss:$16 sps:$4 sm:$0xff]  }
 0x1d5   :  { %v2894_v52 = vpack.c.bf16 %v2754_v51, %v2751_v25  ;;  %v4136_v25 = vld [vmem:[%s5082_s5 + $0x24] ss:$16 sps:$4 sm:$0xff]  }
 0x1d6   :  { %v4028_v55 = vpop.f32.mrf.mxu1  ;;  %3636 = vmatprep.subr.bf16.mxu1 %v4136_v25  ;;  %v4139_v51 = vld [vmem:[%s5082_s5 + $0x4] ss:$16 sps:$4 sm:$0xff]  }
 0x1d7   :  { %4060 = vmatprep.mubr.msk.bf16.mxu0 %vm2937_vm8, %v2894_v52  ;;  %3637 = vmatpush1.bf16.msra.mxu1 %v4134_v63  ;;  %v4140_v52 = vld [vmem:[%s5082_s5 + $0x28] ss:$16 sps:$4 sm:$0xff]  }
 0x1d8   :  { %v2767_v37 = vpop.f32.mrf.mxu1  ;;  %4061 = vmatmul.mubr.msk.bf16.vlgmr.msra.gmra.mxu0 %vm2937_vm8, %v2895_v23  ;;  %3638 = vmatprep.subr.bf16.mxu1 %v4139_v51  ;;  %v4145_v23 = vld [vmem:[%s5082_s5 + $0xc] ss:$16 sps:$4 sm:$0xff]  }
 0x1d9   :  { %4065 = vmatpush3.bf16.msra.mxu0 %v4126_v32 }
 0x1da   :  { %v4029_v21 = vpop.f32.mrf.mxu1  ;;  %4070 = vmatprep.subr.bf16.mxu0 %v4127_v1 }
 0x1db   :  { %v2897_v30 = vpack.c.bf16 %v4029_v21, %v4028_v55  ;;  %3639 = vmatpush1.bf16.msra.mxu1 %v4137_v35  ;;  %v4143_v55 = vld [vmem:[%s5082_s5 + $0x8] ss:$16 sps:$4 sm:$0xff]  }
 0x1dc   :  { %v2770_v36 = vpop.f32.mrf.mxu1 }
 0x1dd   :  { %v2896_v57 = vpack.c.bf16 %v2770_v36, %v2767_v37 }
 0x1de   :  { %v4032_v42 = vpop.f32.mrf.mxu1 }
 0x1df   :  { %4066 = vmatprep.mubr.msk.bf16.mxu0 %vm2937_vm8, %v2896_v57 }
 0x1e0   :  { %v2783_v48 = vpop.f32.mrf.mxu1  ;;  %4067 = vmatmul.mubr.msk.bf16.vlgmr.msra.gmra.mxu0 %vm2937_vm8, %v2897_v30 }
 0x1e1   :  { %4071 = vmatpush3.bf16.msra.mxu0 %v4127_v1 }
 0x1e2   :  { %v4033_v17 = vpop.f32.mrf.mxu1  ;;  %4076 = vmatprep.subr.bf16.mxu0 %v4128_v45 }
 0x1e3   :  { %v2899_v20 = vpack.c.bf16 %v4033_v17, %v4032_v42 }
 0x1e4   :  { %v2786_v29 = vpop.f32.mrf.mxu1 }
 0x1e5   :  { %v2898_v19 = vpack.c.bf16 %v2786_v29, %v2783_v48 }
 0x1e6   :  { %v4036_v34 = vpop.f32.mrf.mxu1 }
 0x1e7   :  { %4072 = vmatprep.mubr.msk.bf16.mxu0 %vm2937_vm8, %v2898_v19 }
 0x1e8   :  { %v2799_v58 = vpop.f32.mrf.mxu1  ;;  %4073 = vmatmul.mubr.msk.bf16.vlgmr.msra.gmra.mxu0 %vm2937_vm8, %v2899_v20 }
 0x1e9   :  { %4077 = vmatpush3.bf16.msra.mxu0 %v4128_v45 }
 0x1ea   :  { %v4037_v31 = vpop.f32.mrf.mxu1  ;;  %4082 = vmatprep.subr.bf16.mxu0 %v4129_v2 }
 0x1eb   :  { %v2901_v0 = vpack.c.bf16 %v4037_v31, %v4036_v34 }
 0x1ec   :  { %v2802_v38 = vpop.f32.mrf.mxu1 }
 0x1ed   :  { %v2900_v28 = vpack.c.bf16 %v2802_v38, %v2799_v58 }
 0x1ee   :  { %v4040_v18 = vpop.f32.mrf.mxu1 }
 0x1ef   :  { %4078 = vmatprep.mubr.msk.bf16.mxu0 %vm2937_vm8, %v2900_v28 }
 0x1f0   :  { %v2815_v12 = vpop.f32.mrf.mxu1  ;;  %4079 = vmatmul.mubr.msk.bf16.vlgmr.msra.gmra.mxu0 %vm2937_vm8, %v2901_v0 }
 0x1f1   :  { %4083 = vmatpush3.bf16.msra.mxu0 %v4129_v2 }
 0x1f2   :  { %v4041_v46 = vpop.f32.mrf.mxu1  ;;  %4088 = vmatprep.subr.bf16.mxu0 %v4130_v6 }
 0x1f3   :  { %v2903_v8 = vpack.c.bf16 %v4041_v46, %v4040_v18 }
 0x1f4   :  { %v2818_v41 = vpop.f32.mrf.mxu1 }
 0x1f5   :  { %v2902_v47 = vpack.c.bf16 %v2818_v41, %v2815_v12 }
 0x1f6   :  { %v4044_v15 = vpop.f32.mrf.mxu1 }
 0x1f7   :  { %4084 = vmatprep.mubr.msk.bf16.mxu0 %vm2937_vm8, %v2902_v47 }
 0x1f8   :  { %v2831_v53 = vpop.f32.mrf.mxu1  ;;  %4085 = vmatmul.mubr.msk.bf16.vlgmr.msra.gmra.mxu0 %vm2937_vm8, %v2903_v8 }
 0x1f9   :  { %4089 = vmatpush3.bf16.msra.mxu0 %v4130_v6 }
 0x1fa   :  { %v4045_v61 = vpop.f32.mrf.mxu1  ;;  %4094 = vmatprep.subr.bf16.mxu0 %v4131_v44 }
 0x1fb   :  { %v2905_v62 = vpack.c.bf16 %v4045_v61, %v4044_v15 }
 0x1fc   :  { %v2834_v27 = vpop.f32.mrf.mxu1 }
 0x1fd   :  { %v2904_v7 = vpack.c.bf16 %v2834_v27, %v2831_v53 }
 0x1fe   :  { %v4048_v54 = vpop.f32.mrf.mxu1 }
 0x1ff   :  { %4090 = vmatprep.mubr.msk.bf16.mxu0 %vm2937_vm8, %v2904_v7 }
 0x200   :  { %v2847_v4 = vpop.f32.mrf.mxu1  ;;  %4091 = vmatmul.mubr.msk.bf16.vlgmr.msra.gmra.mxu0 %vm2937_vm8, %v2905_v62 }
 0x201   :  { %4095 = vmatpush3.bf16.msra.mxu0 %v4131_v44  ;;  %v3888_v44 = vld [vmem:[%s5083_s4] ss:$0 sm:$0xff] }
 0x202   :  { %v4049_v5 = vpop.f32.mrf.mxu1  ;;  %4100 = vmatprep.subr.bf16.mxu0 %v4132_v3 }
 0x203   :  { %v2907_v39 = vpack.c.bf16 %v4049_v5, %v4048_v54 }
 0x204   :  { %v2850_v22 = vpop.f32.mrf.mxu1 }
 0x205   :  { %v2906_v14 = vpack.c.bf16 %v2850_v22, %v2847_v4 }
 0x206   :  { %v4052_v13 = vpop.f32.mrf.mxu1 }
 0x207   :  { %4096 = vmatprep.mubr.msk.bf16.mxu0 %vm2937_vm8, %v2906_v14 }
 0x208   :  { %v2863_v26 = vpop.f32.mrf.mxu1  ;;  %4097 = vmatmul.mubr.msk.bf16.vlgmr.msra.gmra.mxu0 %vm2937_vm8, %v2907_v39 }
 0x209   :  { %4101 = vmatpush3.bf16.msra.mxu0 %v4132_v3 }
 0x20a   :  { %v4053_v40 = vpop.f32.mrf.mxu1  ;;  %4106 = vmatprep.subr.bf16.mxu0 %v4133_v24 }
 0x20b   :  { %v2909_v50 = vpack.c.bf16 %v4053_v40, %v4052_v13 }
 0x20c   :  { %v2866_v56 = vpop.f32.mrf.mxu1 }
 0x20d   :  { %v2908_v49 = vpack.c.bf16 %v2866_v56, %v2863_v26 }
 0x20f   :  { %4102 = vmatprep.mubr.msk.bf16.mxu0 %vm2937_vm8, %v2908_v49 }
 0x210   :  { %4103 = vmatmul.mubr.msk.bf16.vlgmr.msra.gmra.mxu0 %vm2937_vm8, %v2909_v50 }
 0x211   :  { %4107 = vmatpush3.bf16.msra.mxu0 %v4133_v24 }
 0x214   :  { %v4056_v33 = vpop.f32.mrf.mxu1 }
 0x216   :  { %v2879_v9 = vpop.f32.mrf.mxu1 }
 0x218   :  { %v4057_v43 = vpop.f32.mrf.mxu1 }
 0x219   :  { %v2911_v32 = vpack.c.bf16 %v4057_v43, %v4056_v33 }
 0x21a   :  { %v2882_v59 = vpop.f32.mrf.mxu1 }
 0x21b   :  { %v2910_v60 = vpack.c.bf16 %v2882_v59, %v2879_v9 }
 0x21d   :  { %4108 = vmatprep.mubr.msk.bf16.mxu0 %vm2937_vm8, %v2910_v60 }
 0x21e   :  { %4109 = vmatmul.mubr.msk.bf16.vlgmr.msra.gmra.mxu0 %vm2937_vm8, %v2911_v32 }
 0x21f   :  { %3697 = vmatprep.mubr.bf16.mxu0 %v4146_v16  ;;  %v4142_v16 = vld [vmem:[%s5082_s5 + $0x2c] ss:$16 sps:$4 sm:$0xff]  }
 0x220   :  { %3677 = vmatprep.subr.bf16.mxu0 %v4142_v16 }
 0x221   :  { %3678 = vmatpush1.bf16.msra.mxu0 %v4140_v52 }
 0x222   :  { %3679 = vmatprep.subr.bf16.mxu0 %v4145_v23 }
 0x225   :  { %3680 = vmatpush1.bf16.msra.mxu0 %v4143_v55 }
 0x298   :  { %v4062_v1 = vpop.f32.mrf.mxu0 }
 0x299   :  { %v3001_v61 = vadd.f32 %v4062_v1, %v3888_v44 }
 0x29a   :  { %v2978_v37 = vpop.f32.mrf.mxu0 }
 0x29b   :  { %v2999_v27 = vadd.f32 %v3888_v44, %v2978_v37 }
 0x29c   :  { %v4063_v21 = vpop.f32.mrf.mxu0 }
 0x29d   :  { %v3002_v62 = vadd.f32 %v4063_v21, %v3888_v44 }
 0x29e   :  { %v2981_v36 = vpop.f32.mrf.mxu0 }
 0x29f   :  { %v3000_v4 = vadd.f32 %v3888_v44, %v2981_v36 }
 0x2a0   :  { %v4068_v57 = vpop.f32.mrf.mxu0 }
 0x2a1   :  { %v3066_v54 = vadd.f32 %v4068_v57, %v3001_v61 }
 0x2a2   :  { %v3049_v30 = vpop.f32.mrf.mxu0 }
 0x2a3   :  { %v3064_v3 = vadd.f32 %v3049_v30, %v2999_v27 }
 0x2a4   :  { %v4069_v42 = vpop.f32.mrf.mxu0 }
 0x2a5   :  { %v3067_v5 = vadd.f32 %v4069_v42, %v3002_v62 }
 0x2a6   :  { %v3052_v45 = vpop.f32.mrf.mxu0 }
 0x2a7   :  { %v3065_v13 = vadd.f32 %v3052_v45, %v3000_v4  ;;  %v3603_v4 = vsub.s32 0, %v4228_v11 }
 0x2a8   :  { %v4074_v48 = vpop.f32.mrf.mxu0 }
 0x2a9   :  { %v3131_v22 = vadd.f32 %v4074_v48, %v3066_v54  ;;  %v4148_v54 = vmov 1966171168  }
 0x2aa   :  { %v3114_v17 = vpop.f32.mrf.mxu0 }
 0x2ab   :  { %v3129_v14 = vadd.f32 %v3114_v17, %v3064_v3  ;;  %v3713_v3 = vunpack.c.l.s4 %v4148_v54 }
 0x2ac   :  { %v4075_v29 = vpop.f32.mrf.mxu0 }
 0x2ad   :  { %v3132_v24 = vadd.f32 %v4075_v29, %v3067_v5  ;;  %v3611_v5 = vsub.s32 2, %v4228_v11 }
 0x2ae   :  { %v3117_v19 = vpop.f32.mrf.mxu0 }
 0x2af   :  { %v3130_v56 = vadd.f32 %v3117_v19, %v3065_v13  ;;  %v3714_v13 = vunpack.c.0.s8 %v3713_v3 }
 0x2b0   :  { %v4080_v20 = vpop.f32.mrf.mxu0 }
 0x2b1   :  { %v3196_v26 = vadd.f32 %v4080_v20, %v3131_v22  ;;  %v3607_v22 = vsub.s32 1, %v4228_v11 }
 0x2b2   :  { %v3179_v34 = vpop.f32.mrf.mxu0 }
 0x2b3   :  { %v3194_v40 = vadd.f32 %v3179_v34, %v3129_v14  ;;  %v3615_v14 = vsub.s32 3, %v4228_v11 }
 0x2b4   :  { %v4081_v2 = vpop.f32.mrf.mxu0 }
 0x2b5   :  { %v3197_v49 = vadd.f32 %v4081_v2, %v3132_v24 }
 0x2b6   :  { %v3182_v58 = vpop.f32.mrf.mxu0 }
 0x2b7   :  { %v3195_v43 = vadd.f32 %v3182_v58, %v3130_v56 }
 0x2b8   :  { %v4086_v31 = vpop.f32.mrf.mxu0 }
 0x2b9   :  { %v3261_v50 = vadd.f32 %v4086_v31, %v3196_v26 }
 0x2ba   :  { %v3244_v38 = vpop.f32.mrf.mxu0 }
 0x2bb   :  { %v3259_v33 = vadd.f32 %v3244_v38, %v3194_v40 }
 0x2bc   :  { %v4087_v28 = vpop.f32.mrf.mxu0 }
 0x2bd   :  { %v3262_v59 = vadd.f32 %v4087_v28, %v3197_v49 }
 0x2be   :  { %v3247_v0 = vpop.f32.mrf.mxu0 }
 0x2bf   :  { %v3260_v63 = vadd.f32 %v3247_v0, %v3195_v43 }
 0x2c0   :  { %v4092_v18 = vpop.f32.mrf.mxu0 }
 0x2c1   :  { %v3326_v60 = vadd.f32 %v4092_v18, %v3261_v50 }
 0x2c2   :  { %v3309_v6 = vpop.f32.mrf.mxu0 }
 0x2c3   :  { %v3324_v32 = vadd.f32 %v3309_v6, %v3259_v33 }
 0x2c4   :  { %v4093_v12 = vpop.f32.mrf.mxu0 }
 0x2c5   :  { %v3327_v25 = vadd.f32 %v4093_v12, %v3262_v59 }
 0x2c6   :  { %v3312_v46 = vpop.f32.mrf.mxu0 }
 0x2c7   :  { %v3325_v52 = vadd.f32 %v3312_v46, %v3260_v63 }
 0x2c8   :  { %v4098_v41 = vpop.f32.mrf.mxu0 }
 0x2c9   :  { %v3391_v35 = vadd.f32 %v4098_v41, %v3326_v60 }
 0x2ca   :  { %v3374_v47 = vpop.f32.mrf.mxu0 }
 0x2cb   :  { %v3389_v51 = vadd.f32 %v3374_v47, %v3324_v32 }
 0x2cc   :  { %v4099_v8 = vpop.f32.mrf.mxu0 }
 0x2cd   :  { %v3392_v23 = vadd.f32 %v4099_v8, %v3327_v25 }
 0x2ce   :  { %v3377_v15 = vpop.f32.mrf.mxu0 }
 0x2cf   :  { %v3390_v21 = vadd.f32 %v3377_v15, %v3325_v52 }
 0x2d0   :  { %v4104_v53 = vpop.f32.mrf.mxu0 }
 0x2d1   :  { %v3456_v55 = vadd.f32 %v4104_v53, %v3391_v35 }
 0x2d2   :  { %v3439_v7 = vpop.f32.mrf.mxu0 }
 0x2d3   :  { %v3454_v1 = vadd.f32 %v3439_v7, %v3389_v51 }
 0x2d4   :  { %v4105_v39 = vpop.f32.mrf.mxu0 }
 0x2d5   :  { %v3457_v36 = vadd.f32 %v4105_v39, %v3392_v23  ;;  %v3559_v39 = vld [vmem:[%s5084_s6] sm:$0xf] }
 0x2d6   :  { %v3442_v9 = vpop.f32.mrf.mxu0  ;;  %v3604_v24 = vrot.slane %v3559_v39, %v3603_v4  ;;  %v3612_v26 = vrot.slane %v3559_v39, %v3611_v5  ;;  %v3608_v40 = vrot.slane %v3559_v39, %v3607_v22  ;;  %v3616_v56 = vrot.slane %v3559_v39, %v3615_v14 }
 0x2d7   :  { %v3455_v45 = vadd.f32 %v3442_v9, %v3390_v21  ;;  %v3717_v9 = vsub.s32 %v3714_v13, %v4228_v11 }
 0x2de   :  { %v4110_v16 = vpop.f32.mrf.mxu0 }
 0x2df   :  { %v3521_v57 = vadd.f32 %v4110_v16, %v3456_v55 }
 0x2e0   :  { %v3504_v37 = vpop.f32.mrf.mxu0 }
 0x2e1   :  { %v3519_v30 = vadd.f32 %v3504_v37, %v3454_v1  ;;  %v3529_v19 = vmul.f32 0.2, %v3521_v57  ;;  %vm3525_vm14 = vcmp.gt.f32.partialorder %v3521_v57, 0.0 }
 0x2e2   :  { %v4111_v42 = vpop.f32.mrf.mxu0 }
 0x2e3   :  { %v3527_v48 = vmul.f32 0.2, %v3519_v30  ;;  %v3522_v17 = vadd.f32 %v4111_v42, %v3457_v36  ;;  %vm3523_vm10 = vcmp.gt.f32.partialorder %v3519_v30, 0.0  ;;  %v3533_v31 = vsel %vm3525_vm14, %v3521_v57, %v3529_v19 }
 0x2e4   :  { %v3507_v29 = vpop.f32.mrf.mxu0  ;;  %v3538_v12 = vsel %vm5189_vm0, %v3533_v31, 0.0 }
 0x2e5   :  { %v3520_v20 = vadd.f32 %v3507_v29, %v3455_v45  ;;  %v3531_v34 = vsel %vm3523_vm10, %v3519_v30, %v3527_v48  ;;  %v3530_v2 = vmul.f32 0.2, %v3522_v17  ;;  %vm3526_vm3 = vcmp.gt.f32.partialorder %v3522_v17, 0.0 }
 0x2e6   :  { %v3535_v28 = vsel %vm5187_vm15, %v3531_v34, 0.0 }
 0x2e7   :  { %vm3524_vm4 = vcmp.gt.f32.partialorder %v3520_v20, 0.0  ;;  %v3528_v58 = vmul.f32 0.2, %v3520_v20  ;;  %v3534_v18 = vsel %vm3526_vm3, %v3522_v17, %v3530_v2 }
 0x2e8   :  { %v3540_v41 = vsel %vm5190_vm2, %v3534_v18, 0.0 }
 0x2e9   :  { %v3532_v38 = vsel %vm3524_vm4, %v3520_v20, %v3528_v58 }
 0x2ea   :  { %v3536_v0 = vsel %vm5188_vm5, %v3532_v38, 0.0 }
 0x2eb   :  { %v3537_v6 = vadd.f32 %v3536_v0, %v3535_v28 }
 0x2ed   :  { %v3539_v46 = vadd.f32 %v3538_v12, %v3537_v6 }
 0x2ef   :  { %v3541_v47 = vadd.f32 %v3540_v41, %v3539_v46 }
 0x2f1   :  { %v3542_v8 = vrot.slane %v3541_v47, 4 }
 0x2f3   :  { %v3543_v15 = vadd.f32 %v3542_v8, %v3541_v47 }
 0x2f5   :  { %v3544_v44 = vrot.slane %v3543_v15, 2 }
 0x2f7   :  { %v3545_v53 = vadd.f32 %v3544_v44, %v3543_v15 }
 0x2f9   :  { %v3546_v61 = vrot.slane %v3545_v53, 1 }
 0x2fb   :  { %v3547_v27 = vadd.f32 %v3546_v61, %v3545_v53 }
 0x2fd   :  { %v3549_v7 = vmul.f32 0.03125, %v3547_v27 }
 0x2ff   :  { %v3550_v62 = vpack.c.bf16 %v3549_v7, %v3549_v7 }
 0x301   :  { %3921 = vmatmul.mubr.msk.bf16.vlgmr.msra.gmra.mxu1 %vm5191_vm7, %v3550_v62  ;;  %3922 = vmatmul.mubr.msk.bf16.vlgmr.msra.gmra.mxu0 %vm5192_vm1, %v3550_v62 }
 0x3c1   :  { %v3658_v49 = vpop.f32.mrf.mxu1  ;;  %v3699_v50 = vpop.f32.mrf.mxu0 }
 0x3c2   :  { %v3659_v59 = vadd.f32 %v3658_v49, %v3604_v24  ;;  %v3700_v60 = vadd.f32 %v3699_v50, %v3612_v26 }
 0x3c3   :  { %v3660_v33 = vpop.f32.mrf.mxu1  ;;  %v3701_v43 = vpop.f32.mrf.mxu0 }
 0x3c4   :  { %v3661_v32 = vadd.f32 %v3660_v33, %v3608_v40  ;;  %v3702_v63 = vadd.f32 %v3701_v43, %v3616_v56 }
 0x3c5   :  { %v3662_v25 = vpop.f32.mrf.mxu1  ;;  %v3703_v35 = vpop.f32.mrf.mxu0 }
 0x3c6   :  { %v3710_v51 = vcombine.low %v3659_v59, %v3661_v32  ;;  %v3711_v16 = vcombine.low %v3700_v60, %v3702_v63 }
 0x3c7   :  { %v3663_v52 = vpop.f32.mrf.mxu1  ;;  %v3704_v23 = vpop.f32.mrf.mxu0 }
 0x3c8   :  { %v3718_v55 = vrot.slane %v3710_v51, %v3717_v9  ;;  %v3725_v1 = vrot.slane %v3711_v16, %v3717_v9 }
 0x3ca   :  { %v3726_v37 = vcombine.low %v3718_v55, %v3725_v1 }
 0x3cc   :  { %v3733_v21 = vrot.slane %v3726_v37, %v3717_v9 }
 0x3ce   :  { %3739 = vst.msk [vmem:[%s5085_s7] sm:$0xf] %vm3737_vm6, %v3733_v21 }

</bundles_post_ra>
